<compile_context>
chip_gen: v7x
topology: tpu7x:2x2x1
jax: 0.10.0
libtpu: 0.0.40
codegen_flags: <defaults>
</compile_context>

<pallas_src>
import math
from functools import partial

import jax
import jax.numpy as jnp
from jax.experimental import pallas as pl
from jax.experimental.pallas import tpu as pltpu


# ----------------------------- fused Pallas kernels -----------------------------

def _embed_kernel(c_ref, w_ref, pe_ref, o_ref):
    # c_ref: [1, L, 3C] circular im2col columns; w_ref: [3C, D]; pe_ref: [L, D]
    tok = jnp.dot(c_ref[0].astype(jnp.float32), w_ref[...],
                  preferred_element_type=jnp.float32)
    o_ref[0] = (tok + pe_ref[...]).astype(o_ref.dtype)


def _mha_ln_kernel(xq_ref, xkv_ref, wq_ref, bq_ref, wk_ref, bk_ref,
                   wv_ref, bv_ref, wo_ref, bo_ref, g_ref, b_ref, o_ref,
                   *, n_heads, eps):
    """Fused multi-head attention + residual + post-LayerNorm for one batch element.

    xq_ref:  [1, Lq, D]  query stream (also the residual)
    xkv_ref: [1, Lk, D]  key/value stream (== xq for self-attn, encoder memory for cross-attn)
    wq/wk/wv_ref: [H, D, dh]   per-head projection weights
    wo_ref:       [H, dh, D]   per-head rows of the output projection
    bq/bk/bv_ref: [H, 1, dh],  bo/g/b_ref: [1, D]
    """
    x = xq_ref[0].astype(jnp.float32)      # [Lq, D]
    mem = xkv_ref[0].astype(jnp.float32)   # [Lk, D]
    D = x.shape[-1]
    dh = D // n_heads
    scale = 1.0 / math.sqrt(dh)

    acc = jnp.zeros(x.shape, jnp.float32)  # accumulates concat(heads) @ Wo
    for h in range(n_heads):               # static unroll (small H)
        qh = (jnp.dot(x, wq_ref[h], preferred_element_type=jnp.float32) + bq_ref[h]) * scale
        kh = jnp.dot(mem, wk_ref[h], preferred_element_type=jnp.float32) + bk_ref[h]
        vh = jnp.dot(mem, wv_ref[h], preferred_element_type=jnp.float32) + bv_ref[h]
        # scores = qh @ kh^T via dot_general (no materialized transpose)
        s = jax.lax.dot_general(qh, kh, (((1,), (1,)), ((), ())),
                                preferred_element_type=jnp.float32)      # [Lq, Lk]
        smax = jnp.max(s, axis=-1, keepdims=True)
        p = jnp.exp(s - smax)
        p = p * pl.reciprocal(jnp.sum(p, axis=-1, keepdims=True), approx=True)
        oh = jnp.dot(p, vh, preferred_element_type=jnp.float32)          # [Lq, dh]
        acc = acc + jnp.dot(oh, wo_ref[h], preferred_element_type=jnp.float32)

    y = x + acc + bo_ref[...]              # residual + out-proj bias
    mu = jnp.mean(y, axis=-1, keepdims=True)
    var = jnp.mean(jnp.square(y - mu), axis=-1, keepdims=True)
    y = (y - mu) * jax.lax.rsqrt(var + eps)
    o_ref[0] = (y * g_ref[...] + b_ref[...]).astype(o_ref.dtype)


def _ffn_ln_kernel(x_ref, w1_ref, b1_ref, w2_ref, b2_ref, g_ref, b_ref, o_ref, *, eps):
    # Fused linear1 + ReLU + linear2 + residual + LayerNorm, one batch element.
    x = x_ref[0].astype(jnp.float32)       # [L, D]
    h = jnp.dot(x, w1_ref[...], preferred_element_type=jnp.float32) + b1_ref[...]
    h = jnp.maximum(h, 0.0)
    f = jnp.dot(h, w2_ref[...], preferred_element_type=jnp.float32) + b2_ref[...]
    y = x + f
    mu = jnp.mean(y, axis=-1, keepdims=True)
    var = jnp.mean(jnp.square(y - mu), axis=-1, keepdims=True)
    y = (y - mu) * jax.lax.rsqrt(var + eps)
    o_ref[0] = (y * g_ref[...] + b_ref[...]).astype(o_ref.dtype)


def _ln_kernel(x_ref, g_ref, b_ref, o_ref, *, eps):
    x = x_ref[...].astype(jnp.float32)
    mu = jnp.mean(x, axis=-1, keepdims=True)
    var = jnp.mean(jnp.square(x - mu), axis=-1, keepdims=True)
    y = (x - mu) * jax.lax.rsqrt(var + eps)
    o_ref[...] = (y * g_ref[...] + b_ref[...]).astype(o_ref.dtype)


def _ln_head_kernel(x_ref, g_ref, b_ref, w_ref, bo_ref, o_ref, *, eps):
    # Final decoder LayerNorm fused with the output Linear head.
    x = x_ref[...].astype(jnp.float32)
    mu = jnp.mean(x, axis=-1, keepdims=True)
    var = jnp.mean(jnp.square(x - mu), axis=-1, keepdims=True)
    y = (x - mu) * jax.lax.rsqrt(var + eps) * g_ref[...] + b_ref[...]
    o_ref[...] = (jnp.dot(y, w_ref[...], preferred_element_type=jnp.float32)
                  + bo_ref[...]).astype(o_ref.dtype)


# ----------------------------- pallas_call wrappers -----------------------------

def fused_embedding(x, w_conv, pe):
    """TokenEmbedding Conv1d(c_in, d_model, k=3, circular, bias=False) + sinusoidal PE.

    Circular im2col (tiny [B,L,3C] temp) is built on the host; the conv matmul and PE add
    are fused in one kernel per batch element.
    """
    B, L, C = x.shape
    threeC, D = w_conv.shape
    cols = jnp.concatenate([jnp.roll(x, 1, axis=1), x, jnp.roll(x, -1, axis=1)], axis=-1)
    return pl.pallas_call(
        _embed_kernel,
        out_shape=jax.ShapeDtypeStruct((B, L, D), jnp.float32),
        grid=(B,),
        in_specs=[pl.BlockSpec((1, L, threeC), lambda b: (b, 0, 0)),
                  pl.BlockSpec((threeC, D), lambda b: (0, 0)),
                  pl.BlockSpec((L, D), lambda b: (0, 0))],
        out_specs=pl.BlockSpec((1, L, D), lambda b: (b, 0, 0)),
        compiler_params=pltpu.CompilerParams(dimension_semantics=("parallel",)),
        cost_estimate=pl.CostEstimate(flops=2 * B * L * threeC * D, transcendentals=0,
                                      bytes_accessed=4 * (B * L * (threeC + D) + threeC * D + L * D)),
    )(cols, w_conv, pe)


def fused_mha_layernorm(p, ln_g, ln_b, xq, xkv, n_heads, eps=1e-5):
    B, Lq, D = xq.shape
    _, Lk, _ = xkv.shape
    dh = D // n_heads

    # Per-head weight layout (host-side reshape of standard [D, D] / [D] params, done once
    # under jit). Keeps the kernel free of in-kernel lane slicing / concats.
    wq = p["wq"].reshape(D, n_heads, dh).transpose(1, 0, 2)   # [H, D, dh]
    wk = p["wk"].reshape(D, n_heads, dh).transpose(1, 0, 2)
    wv = p["wv"].reshape(D, n_heads, dh).transpose(1, 0, 2)
    wo = p["wo"].reshape(n_heads, dh, D)                      # [H, dh, D]
    bq = p["bq"].reshape(n_heads, 1, dh)
    bk = p["bk"].reshape(n_heads, 1, dh)
    bv = p["bv"].reshape(n_heads, 1, dh)
    bo = p["bo"].reshape(1, D)

    flops = 2 * B * ((Lq + 2 * Lk) * D * D + 2 * Lq * Lk * D + Lq * D * D)
    cost = pl.CostEstimate(
        flops=flops, transcendentals=B * n_heads * Lq * Lk,
        bytes_accessed=4 * (2 * B * Lq * D + B * Lk * D + 4 * D * D + 6 * D))

    def full(shape):
        return pl.BlockSpec(shape, lambda b: (0,) * len(shape))

    return pl.pallas_call(
        partial(_mha_ln_kernel, n_heads=n_heads, eps=eps),
        out_shape=jax.ShapeDtypeStruct((B, Lq, D), jnp.float32),
        grid=(B,),
        in_specs=[pl.BlockSpec((1, Lq, D), lambda b: (b, 0, 0)),
                  pl.BlockSpec((1, Lk, D), lambda b: (b, 0, 0)),
                  full((n_heads, D, dh)), full((n_heads, 1, dh)),
                  full((n_heads, D, dh)), full((n_heads, 1, dh)),
                  full((n_heads, D, dh)), full((n_heads, 1, dh)),
                  full((n_heads, dh, D)), full((1, D)),
                  full((1, D)), full((1, D))],
        out_specs=pl.BlockSpec((1, Lq, D), lambda b: (b, 0, 0)),
        compiler_params=pltpu.CompilerParams(dimension_semantics=("parallel",)),
        cost_estimate=cost,
    )(xq, xkv, wq, bq, wk, bk, wv, bv, wo, bo,
      ln_g.reshape(1, D), ln_b.reshape(1, D))


def fused_ffn_layernorm(p, ln_g, ln_b, x, eps=1e-5):
    B, L, D = x.shape
    F = p["w1"].shape[1]
    cost = pl.CostEstimate(flops=4 * B * L * D * F, transcendentals=0,
                           bytes_accessed=4 * (2 * B * L * D + 2 * D * F + F + 3 * D))
    return pl.pallas_call(
        partial(_ffn_ln_kernel, eps=eps),
        out_shape=jax.ShapeDtypeStruct((B, L, D), jnp.float32),
        grid=(B,),
        in_specs=[pl.BlockSpec((1, L, D), lambda b: (b, 0, 0)),
                  pl.BlockSpec((D, F), lambda b: (0, 0)),
                  pl.BlockSpec((1, F), lambda b: (0, 0)),
                  pl.BlockSpec((F, D), lambda b: (0, 0)),
                  pl.BlockSpec((1, D), lambda b: (0, 0)),
                  pl.BlockSpec((1, D), lambda b: (0, 0)),
                  pl.BlockSpec((1, D), lambda b: (0, 0))],
        out_specs=pl.BlockSpec((1, L, D), lambda b: (b, 0, 0)),
        compiler_params=pltpu.CompilerParams(dimension_semantics=("parallel",)),
        cost_estimate=cost,
    )(x, p["w1"], p["b1"].reshape(1, F), p["w2"], p["b2"].reshape(1, D),
      ln_g.reshape(1, D), ln_b.reshape(1, D))


def pallas_layernorm(x, g, b, eps=1e-5):
    B, L, D = x.shape
    out = pl.pallas_call(
        partial(_ln_kernel, eps=eps),
        out_shape=jax.ShapeDtypeStruct((B * L, D), jnp.float32),
        grid=(1,),
        in_specs=[pl.BlockSpec((B * L, D), lambda i: (0, 0)),
                  pl.BlockSpec((1, D), lambda i: (0, 0)),
                  pl.BlockSpec((1, D), lambda i: (0, 0))],
        out_specs=pl.BlockSpec((B * L, D), lambda i: (0, 0)),
    )(x.reshape(B * L, D), g.reshape(1, D), b.reshape(1, D))
    return out.reshape(B, L, D)


def fused_final_norm_head(x, g, b, w_out, b_out, eps=1e-5):
    B, L, D = x.shape
    N = w_out.shape[1]
    out = pl.pallas_call(
        partial(_ln_head_kernel, eps=eps),
        out_shape=jax.ShapeDtypeStruct((B * L, N), jnp.float32),
        grid=(1,),
        in_specs=[pl.BlockSpec((B * L, D), lambda i: (0, 0)),
                  pl.BlockSpec((1, D), lambda i: (0, 0)),
                  pl.BlockSpec((1, D), lambda i: (0, 0)),
                  pl.BlockSpec((D, N), lambda i: (0, 0)),
                  pl.BlockSpec((1, N), lambda i: (0, 0))],
        out_specs=pl.BlockSpec((B * L, N), lambda i: (0, 0)),
        cost_estimate=pl.CostEstimate(flops=2 * B * L * D * N, transcendentals=0,
                                      bytes_accessed=4 * (B * L * (D + N) + D * N + 2 * D + N)),
    )(x.reshape(B * L, D), g.reshape(1, D), b.reshape(1, D), w_out, b_out.reshape(1, N))
    return out.reshape(B, L, N)


# ----------------------------- model glue -----------------------------

def encoder_layer(p, x, n_heads):
    x = fused_mha_layernorm(p["self_attn"], p["ln1_g"], p["ln1_b"], x, x, n_heads)
    x = fused_ffn_layernorm(p, p["ln2_g"], p["ln2_b"], x)
    return x


def decoder_layer(p, x, memory, n_heads):
    # TODO(synk): no causal mask, matching the reference which calls nn.Transformer without tgt_mask.
    x = fused_mha_layernorm(p["self_attn"], p["ln1_g"], p["ln1_b"], x, x, n_heads)
    x = fused_mha_layernorm(p["cross_attn"], p["ln2_g"], p["ln2_b"], x, memory, n_heads)
    x = fused_ffn_layernorm(p, p["ln3_g"], p["ln3_b"], x)
    return x


def sinusoidal_pe(L, d_model):
    pos = jnp.arange(L, dtype=jnp.float32)[:, None]
    div = jnp.exp(jnp.arange(0, d_model, 2, dtype=jnp.float32) * (-math.log(10000.0) / d_model))
    pe = jnp.zeros((L, d_model), jnp.float32)
    pe = pe.at[:, 0::2].set(jnp.sin(pos * div))
    pe = pe.at[:, 1::2].set(jnp.cos(pos * div))
    return pe  # constant-folded under jit (static L, d_model)


def transformer_forward(params, src, tgt, *, n_heads):
    # TODO(synk): original DataEmbedding definition not included in the source file;
    # Informer-style (circular token conv + sinusoidal positional) embedding is assumed,
    # temporal embedding omitted. Dropout layers are identity (eval mode).
    d_model = params["enc_emb"]["w_conv"].shape[1]
    pe_s = sinusoidal_pe(src.shape[1], d_model)
    pe_t = sinusoidal_pe(tgt.shape[1], d_model)

    x = fused_embedding(src, params["enc_emb"]["w_conv"], pe_s)
    y = fused_embedding(tgt, params["dec_emb"]["w_conv"], pe_t)

    for lp in params["enc_layers"]:
        x = encoder_layer(lp, x, n_heads)
    memory = pallas_layernorm(x, params["enc_norm_g"], params["enc_norm_b"])

    for lp in params["dec_layers"]:
        y = decoder_layer(lp, y, memory, n_heads)

    return fused_final_norm_head(y, params["dec_norm_g"], params["dec_norm_b"],
                                 params["w_out"], params["b_out"])


# ----------------------------- deterministic parameter init -----------------------------

def _lin_init(key, din, dout):
    k1, k2 = jax.random.split(key)
    w = jax.random.normal(k1, (din, dout), jnp.float32) * (1.0 / math.sqrt(din))
    b = jax.random.normal(k2, (dout,), jnp.float32) * 0.02
    return w, b


def _attn_init(key, d_model):
    ks = jax.random.split(key, 4)
    p = {}
    p["wq"], p["bq"] = _lin_init(ks[0], d_model, d_model)
    p["wk"], p["bk"] = _lin_init(ks[1], d_model, d_model)
    p["wv"], p["bv"] = _lin_init(ks[2], d_model, d_model)
    p["wo"], p["bo"] = _lin_init(ks[3], d_model, d_model)
    return p


def _enc_layer_init(key, d_model, d_ff):
    ks = jax.random.split(key, 3)
    p = {"self_attn": _attn_init(ks[0], d_model)}
    p["w1"], p["b1"] = _lin_init(ks[1], d_model, d_ff)
    p["w2"], p["b2"] = _lin_init(ks[2], d_ff, d_model)
    p["ln1_g"], p["ln1_b"] = jnp.ones((d_model,), jnp.float32), jnp.zeros((d_model,), jnp.float32)
    p["ln2_g"], p["ln2_b"] = jnp.ones((d_model,), jnp.float32), jnp.zeros((d_model,), jnp.float32)
    return p


def _dec_layer_init(key, d_model, d_ff):
    ks = jax.random.split(key, 4)
    p = {"self_attn": _attn_init(ks[0], d_model), "cross_attn": _attn_init(ks[1], d_model)}
    p["w1"], p["b1"] = _lin_init(ks[2], d_model, d_ff)
    p["w2"], p["b2"] = _lin_init(ks[3], d_ff, d_model)
    for i in (1, 2, 3):
        p[f"ln{i}_g"] = jnp.ones((d_model,), jnp.float32)
        p[f"ln{i}_b"] = jnp.zeros((d_model,), jnp.float32)
    return p


def _emb_init(key, c_in, d_model):
    # Conv1d weight flattened tap-major as [x[l-1] | x[l] | x[l+1]] blocks of size c_in each.
    w = jax.random.normal(key, (3 * c_in, d_model), jnp.float32) * (1.0 / math.sqrt(3 * c_in))
    return {"w_conv": w}  # Conv1d bias=False


def init_params(key, input_size, output_size, d_model, n_heads, n_enc, n_dec, d_ff):
    keys = jax.random.split(key, n_enc + n_dec + 4)
    params = {
        "enc_emb": _emb_init(keys[0], input_size, d_model),
        "dec_emb": _emb_init(keys[1], input_size, d_model),
        "enc_layers": [_enc_layer_init(keys[2 + i], d_model, d_ff) for i in range(n_enc)],
        "dec_layers": [_dec_layer_init(keys[2 + n_enc + i], d_model, d_ff) for i in range(n_dec)],
        "enc_norm_g": jnp.ones((d_model,), jnp.float32),
        "enc_norm_b": jnp.zeros((d_model,), jnp.float32),
        "dec_norm_g": jnp.ones((d_model,), jnp.float32),
        "dec_norm_b": jnp.zeros((d_model,), jnp.float32),
    }
    params["w_out"], params["b_out"] = _lin_init(keys[2 + n_enc + n_dec], d_model, output_size)
    return params


# ----------------------------- main -----------------------------

if __name__ == "__main__":
    B, Ls, Lt = 2, 8, 8
    input_size, output_size = 4, 3
    d_model, n_heads, n_enc, n_dec, d_ff = 32, 4, 2, 2, 64

    key = jax.random.PRNGKey(0)
    kp, ks, kt = jax.random.split(key, 3)
    params = init_params(kp, input_size, output_size, d_model, n_heads, n_enc, n_dec, d_ff)

    src = jax.random.normal(ks, (B, Ls, input_size), jnp.float32)
    tgt = jax.random.normal(kt, (B, Lt, input_size), jnp.float32)

    fwd = jax.jit(transformer_forward, static_argnames=("n_heads",))
    out = fwd(params, src, tgt, n_heads=n_heads)
    out = jax.block_until_ready(out)

    assert out.shape == (B, Lt, output_size), out.shape
    assert bool(jnp.all(jnp.isfinite(out)))
    print("KERNEL_OK")
</pallas_src>

<mosaic_0001>
module attributes {stable_mosaic.version = 11 : i64} {
  func.func @_embed_kernel(%arg0: i32, %arg1: memref<1x8x12xf32, #tpu.memory_space<vmem>>, %arg2: memref<12x32xf32, #tpu.memory_space<vmem>>, %arg3: memref<8x32xf32, #tpu.memory_space<vmem>>, %arg4: memref<1x8x32xf32, #tpu.memory_space<vmem>>) attributes {dimension_semantics = [#tpu.dimension_semantics<parallel>], iteration_bounds = array<i64: 2>, scalar_prefetch = 0 : i64, scratch_operands = 0 : i64, tpu.core_type = #tpu.core_type<tc>, window_params = [{transform_indices = @transform_0, window_bounds = array<i64: 1, 8, 12>}, {pipeline_mode = #tpu.pipeline_mode<synchronous>, transform_indices = @transform_1, window_bounds = array<i64: 12, 32>}, {pipeline_mode = #tpu.pipeline_mode<synchronous>, transform_indices = @transform_2, window_bounds = array<i64: 8, 32>}, {transform_indices = @transform_3, window_bounds = array<i64: 1, 8, 32>}]} {
    %c0 = arith.constant 0 : index
    %c0_0 = arith.constant 0 : index
    %c0_1 = arith.constant 0 : index
    %0 = vector.load %arg1[%c0, %c0_0, %c0_1] : memref<1x8x12xf32, #tpu.memory_space<vmem>>, vector<1x8x12xf32>
    %1 = vector.shape_cast %0 : vector<1x8x12xf32> to vector<8x12xf32>
    %c0_2 = arith.constant 0 : index
    %c0_3 = arith.constant 0 : index
    %2 = vector.load %arg2[%c0_2, %c0_3] : memref<12x32xf32, #tpu.memory_space<vmem>>, vector<12x32xf32>
    %cst = arith.constant dense<0.000000e+00> : vector<8x32xf32>
    %3 = tpu.matmul %1, %2, %cst {dimension_numbers = #tpu.dot_dimension_numbers<[1], [0], [0], [1], [0, 0, 1, 1], [], []>} : vector<8x12xf32>, vector<12x32xf32>, vector<8x32xf32> -> vector<8x32xf32>
    %c0_4 = arith.constant 0 : index
    %c0_5 = arith.constant 0 : index
    %4 = vector.load %arg3[%c0_4, %c0_5] : memref<8x32xf32, #tpu.memory_space<vmem>>, vector<8x32xf32>
    %5 = arith.addf %3, %4 : vector<8x32xf32>
    %c0_6 = arith.constant 0 : index
    %c0_7 = arith.constant 0 : index
    %c0_8 = arith.constant 0 : index
    %6 = vector.load %arg4[%c0_6, %c0_7, %c0_8] : memref<1x8x32xf32, #tpu.memory_space<vmem>>, vector<1x8x32xf32>
    %7 = vector.shape_cast %6 : vector<1x8x32xf32> to vector<8x32xf32>
    %8 = vector.shape_cast %5 : vector<8x32xf32> to vector<1x8x32xf32>
    tpu.vector_store %arg4[%c0_6, %c0_7, %c0_8], %8 {strides = array<i32>} : memref<1x8x32xf32, #tpu.memory_space<vmem>>, vector<1x8x32xf32>,
    return
  }
  func.func @transform_0(%arg0: i32) -> (i32, i32, i32) {
    %c0_i32 = arith.constant 0 : i32
    %c0_i32_0 = arith.constant 0 : i32
    %c0_i32_1 = arith.constant 0 : i32
    return %arg0, %c0_i32, %c0_i32_0 : i32, i32, i32
  }
  func.func @transform_1(%arg0: i32) -> (i32, i32) {
    %c0_i32 = arith.constant 0 : i32
    %c0_i32_0 = arith.constant 0 : i32
    %c0_i32_1 = arith.constant 0 : i32
    return %c0_i32, %c0_i32_0 : i32, i32
  }
  func.func @transform_2(%arg0: i32) -> (i32, i32) {
    %c0_i32 = arith.constant 0 : i32
    %c0_i32_0 = arith.constant 0 : i32
    %c0_i32_1 = arith.constant 0 : i32
    return %c0_i32, %c0_i32_0 : i32, i32
  }
  func.func @transform_3(%arg0: i32) -> (i32, i32, i32) {
    %c0_i32 = arith.constant 0 : i32
    %c0_i32_0 = arith.constant 0 : i32
    %c0_i32_1 = arith.constant 0 : i32
    return %arg0, %c0_i32, %c0_i32_0 : i32, i32, i32
  }
}

module attributes {stable_mosaic.version = 11 : i64} {
  func.func @_mha_ln_kernel(%arg0: i32, %arg1: memref<1x8x32xf32, #tpu.memory_space<vmem>>, %arg2: memref<1x8x32xf32, #tpu.memory_space<vmem>>, %arg3: memref<4x32x8xf32, #tpu.memory_space<vmem>>, %arg4: memref<4x1x8xf32, #tpu.memory_space<vmem>>, %arg5: memref<4x32x8xf32, #tpu.memory_space<vmem>>, %arg6: memref<4x1x8xf32, #tpu.memory_space<vmem>>, %arg7: memref<4x32x8xf32, #tpu.memory_space<vmem>>, %arg8: memref<4x1x8xf32, #tpu.memory_space<vmem>>, %arg9: memref<4x8x32xf32, #tpu.memory_space<vmem>>, %arg10: memref<1x32xf32, #tpu.memory_space<vmem>>, %arg11: memref<1x32xf32, #tpu.memory_space<vmem>>, %arg12: memref<1x32xf32, #tpu.memory_space<vmem>>, %arg13: memref<1x8x32xf32, #tpu.memory_space<vmem>>) attributes {dimension_semantics = [#tpu.dimension_semantics<parallel>], iteration_bounds = array<i64: 2>, scalar_prefetch = 0 : i64, scratch_operands = 0 : i64, tpu.core_type = #tpu.core_type<tc>, window_params = [{transform_indices = @transform_0, window_bounds = array<i64: 1, 8, 32>}, {transform_indices = @transform_1, window_bounds = array<i64: 1, 8, 32>}, {pipeline_mode = #tpu.pipeline_mode<synchronous>, transform_indices = @transform_2, window_bounds = array<i64: 4, 32, 8>}, {pipeline_mode = #tpu.pipeline_mode<synchronous>, transform_indices = @transform_3, window_bounds = array<i64: 4, 1, 8>}, {pipeline_mode = #tpu.pipeline_mode<synchronous>, transform_indices = @transform_4, window_bounds = array<i64: 4, 32, 8>}, {pipeline_mode = #tpu.pipeline_mode<synchronous>, transform_indices = @transform_5, window_bounds = array<i64: 4, 1, 8>}, {pipeline_mode = #tpu.pipeline_mode<synchronous>, transform_indices = @transform_6, window_bounds = array<i64: 4, 32, 8>}, {pipeline_mode = #tpu.pipeline_mode<synchronous>, transform_indices = @transform_7, window_bounds = array<i64: 4, 1, 8>}, {pipeline_mode = #tpu.pipeline_mode<synchronous>, transform_indices = @transform_8, window_bounds = array<i64: 4, 8, 32>}, {pipeline_mode = #tpu.pipeline_mode<synchronous>, transform_indices = @transform_9, window_bounds = array<i64: 1, 32>}, {pipeline_mode = #tpu.pipeline_mode<synchronous>, transform_indices = @transform_10, window_bounds = array<i64: 1, 32>}, {pipeline_mode = #tpu.pipeline_mode<synchronous>, transform_indices = @transform_11, window_bounds = array<i64: 1, 32>}, {transform_indices = @transform_12, window_bounds = array<i64: 1, 8, 32>}]} {
    %c0 = arith.constant 0 : index
    %c0_0 = arith.constant 0 : index
    %c0_1 = arith.constant 0 : index
    %0 = vector.load %arg1[%c0, %c0_0, %c0_1] : memref<1x8x32xf32, #tpu.memory_space<vmem>>, vector<1x8x32xf32>
    %1 = vector.shape_cast %0 : vector<1x8x32xf32> to vector<8x32xf32>
    %c0_2 = arith.constant 0 : index
    %c0_3 = arith.constant 0 : index
    %c0_4 = arith.constant 0 : index
    %2 = vector.load %arg2[%c0_2, %c0_3, %c0_4] : memref<1x8x32xf32, #tpu.memory_space<vmem>>, vector<1x8x32xf32>
    %3 = vector.shape_cast %2 : vector<1x8x32xf32> to vector<8x32xf32>
    %cst = arith.constant 0.000000e+00 : f32
    %4 = vector.broadcast %cst : f32 to vector<8x32xf32>
    %c0_5 = arith.constant 0 : index
    %c0_6 = arith.constant 0 : index
    %c0_7 = arith.constant 0 : index
    %5 = vector.load %arg3[%c0_5, %c0_6, %c0_7] : memref<4x32x8xf32, #tpu.memory_space<vmem>>, vector<1x32x8xf32>
    %6 = vector.shape_cast %5 : vector<1x32x8xf32> to vector<32x8xf32>
    %cst_8 = arith.constant dense<0.000000e+00> : vector<8x8xf32>
    %7 = tpu.matmul %1, %6, %cst_8 {dimension_numbers = #tpu.dot_dimension_numbers<[1], [0], [0], [1], [0, 0, 1, 1], [], []>} : vector<8x32xf32>, vector<32x8xf32>, vector<8x8xf32> -> vector<8x8xf32>
    %c0_9 = arith.constant 0 : index
    %c0_10 = arith.constant 0 : index
    %c0_11 = arith.constant 0 : index
    %8 = vector.load %arg4[%c0_9, %c0_10, %c0_11] : memref<4x1x8xf32, #tpu.memory_space<vmem>>, vector<1x1x8xf32>
    %9 = vector.shape_cast %8 : vector<1x1x8xf32> to vector<1x8xf32>
    %10 = vector.broadcast %9 : vector<1x8xf32> to vector<8x8xf32>
    %11 = arith.addf %7, %10 : vector<8x8xf32>
    %cst_12 = arith.constant 0.353553385 : f32
    %12 = vector.broadcast %cst_12 : f32 to vector<8x8xf32>
    %13 = arith.mulf %11, %12 : vector<8x8xf32>
    %c0_13 = arith.constant 0 : index
    %c0_14 = arith.constant 0 : index
    %c0_15 = arith.constant 0 : index
    %14 = vector.load %arg5[%c0_13, %c0_14, %c0_15] : memref<4x32x8xf32, #tpu.memory_space<vmem>>, vector<1x32x8xf32>
    %15 = vector.shape_cast %14 : vector<1x32x8xf32> to vector<32x8xf32>
    %cst_16 = arith.constant dense<0.000000e+00> : vector<8x8xf32>
    %16 = tpu.matmul %3, %15, %cst_16 {dimension_numbers = #tpu.dot_dimension_numbers<[1], [0], [0], [1], [0, 0, 1, 1], [], []>} : vector<8x32xf32>, vector<32x8xf32>, vector<8x8xf32> -> vector<8x8xf32>
    %c0_17 = arith.constant 0 : index
    %c0_18 = arith.constant 0 : index
    %c0_19 = arith.constant 0 : index
    %17 = vector.load %arg6[%c0_17, %c0_18, %c0_19] : memref<4x1x8xf32, #tpu.memory_space<vmem>>, vector<1x1x8xf32>
    %18 = vector.shape_cast %17 : vector<1x1x8xf32> to vector<1x8xf32>
    %19 = vector.broadcast %18 : vector<1x8xf32> to vector<8x8xf32>
    %20 = arith.addf %16, %19 : vector<8x8xf32>
    %c0_20 = arith.constant 0 : index
    %c0_21 = arith.constant 0 : index
    %c0_22 = arith.constant 0 : index
    %21 = vector.load %arg7[%c0_20, %c0_21, %c0_22] : memref<4x32x8xf32, #tpu.memory_space<vmem>>, vector<1x32x8xf32>
    %22 = vector.shape_cast %21 : vector<1x32x8xf32> to vector<32x8xf32>
    %cst_23 = arith.constant dense<0.000000e+00> : vector<8x8xf32>
    %23 = tpu.matmul %3, %22, %cst_23 {dimension_numbers = #tpu.dot_dimension_numbers<[1], [0], [0], [1], [0, 0, 1, 1], [], []>} : vector<8x32xf32>, vector<32x8xf32>, vector<8x8xf32> -> vector<8x8xf32>
    %c0_24 = arith.constant 0 : index
    %c0_25 = arith.constant 0 : index
    %c0_26 = arith.constant 0 : index
    %24 = vector.load %arg8[%c0_24, %c0_25, %c0_26] : memref<4x1x8xf32, #tpu.memory_space<vmem>>, vector<1x1x8xf32>
    %25 = vector.shape_cast %24 : vector<1x1x8xf32> to vector<1x8xf32>
    %26 = vector.broadcast %25 : vector<1x8xf32> to vector<8x8xf32>
    %27 = arith.addf %23, %26 : vector<8x8xf32>
    %cst_27 = arith.constant dense<0.000000e+00> : vector<8x8xf32>
    %28 = tpu.matmul %13, %20, %cst_27 {dimension_numbers = #tpu.dot_dimension_numbers<[1], [1], [0], [0], [0, 0, 1, 0], [], []>} : vector<8x8xf32>, vector<8x8xf32>, vector<8x8xf32> -> vector<8x8xf32>
    %cst_28 = arith.constant dense<0xFF800000> : vector<8xf32>
    %29 = vector.multi_reduction <maximumf>, %28, %cst_28 [1] : vector<8x8xf32> to vector<8xf32>
    %30 = vector.shape_cast %29 : vector<8xf32> to vector<8x1xf32>
    %31 = vector.broadcast %30 : vector<8x1xf32> to vector<8x8xf32>
    %32 = arith.subf %28, %31 : vector<8x8xf32>
    %33 = math.exp %32 : vector<8x8xf32>
    %cst_29 = arith.constant dense<0.000000e+00> : vector<8xf32>
    %34 = vector.multi_reduction <add>, %33, %cst_29 [1] : vector<8x8xf32> to vector<8xf32>
    %35 = vector.shape_cast %34 : vector<8xf32> to vector<8x1xf32>
    %36 = tpu.reciprocal %35 {approx = true} : vector<8x1xf32> -> vector<8x1xf32>
    %37 = vector.broadcast %36 : vector<8x1xf32> to vector<8x8xf32>
    %38 = arith.mulf %33, %37 : vector<8x8xf32>
    %cst_30 = arith.constant dense<0.000000e+00> : vector<8x8xf32>
    %39 = tpu.matmul %38, %27, %cst_30 {dimension_numbers = #tpu.dot_dimension_numbers<[1], [0], [0], [1], [0, 0, 1, 1], [], []>} : vector<8x8xf32>, vector<8x8xf32>, vector<8x8xf32> -> vector<8x8xf32>
    %c0_31 = arith.constant 0 : index
    %c0_32 = arith.constant 0 : index
    %c0_33 = arith.constant 0 : index
    %40 = vector.load %arg9[%c0_31, %c0_32, %c0_33] : memref<4x8x32xf32, #tpu.memory_space<vmem>>, vector<1x8x32xf32>
    %41 = vector.shape_cast %40 : vector<1x8x32xf32> to vector<8x32xf32>
    %cst_34 = arith.constant dense<0.000000e+00> : vector<8x32xf32>
    %42 = tpu.matmul %39, %41, %cst_34 {dimension_numbers = #tpu.dot_dimension_numbers<[1], [0], [0], [1], [0, 0, 1, 1], [], []>} : vector<8x8xf32>, vector<8x32xf32>, vector<8x32xf32> -> vector<8x32xf32>
    %43 = arith.addf %4, %42 : vector<8x32xf32>
    %c1 = arith.constant 1 : index
    %c0_35 = arith.constant 0 : index
    %c0_36 = arith.constant 0 : index
    %44 = vector.load %arg3[%c1, %c0_35, %c0_36] : memref<4x32x8xf32, #tpu.memory_space<vmem>>, vector<1x32x8xf32>
    %45 = vector.shape_cast %44 : vector<1x32x8xf32> to vector<32x8xf32>
    %cst_37 = arith.constant dense<0.000000e+00> : vector<8x8xf32>
    %46 = tpu.matmul %1, %45, %cst_37 {dimension_numbers = #tpu.dot_dimension_numbers<[1], [0], [0], [1], [0, 0, 1, 1], [], []>} : vector<8x32xf32>, vector<32x8xf32>, vector<8x8xf32> -> vector<8x8xf32>
    %c1_38 = arith.constant 1 : index
    %c0_39 = arith.constant 0 : index
    %c0_40 = arith.constant 0 : index
    %47 = vector.load %arg4[%c1_38, %c0_39, %c0_40] : memref<4x1x8xf32, #tpu.memory_space<vmem>>, vector<1x1x8xf32>
    %48 = vector.shape_cast %47 : vector<1x1x8xf32> to vector<1x8xf32>
    %49 = vector.broadcast %48 : vector<1x8xf32> to vector<8x8xf32>
    %50 = arith.addf %46, %49 : vector<8x8xf32>
    %cst_41 = arith.constant 0.353553385 : f32
    %51 = vector.broadcast %cst_41 : f32 to vector<8x8xf32>
    %52 = arith.mulf %50, %51 : vector<8x8xf32>
    %c1_42 = arith.constant 1 : index
    %c0_43 = arith.constant 0 : index
    %c0_44 = arith.constant 0 : index
    %53 = vector.load %arg5[%c1_42, %c0_43, %c0_44] : memref<4x32x8xf32, #tpu.memory_space<vmem>>, vector<1x32x8xf32>
    %54 = vector.shape_cast %53 : vector<1x32x8xf32> to vector<32x8xf32>
    %cst_45 = arith.constant dense<0.000000e+00> : vector<8x8xf32>
    %55 = tpu.matmul %3, %54, %cst_45 {dimension_numbers = #tpu.dot_dimension_numbers<[1], [0], [0], [1], [0, 0, 1, 1], [], []>} : vector<8x32xf32>, vector<32x8xf32>, vector<8x8xf32> -> vector<8x8xf32>
    %c1_46 = arith.constant 1 : index
    %c0_47 = arith.constant 0 : index
    %c0_48 = arith.constant 0 : index
    %56 = vector.load %arg6[%c1_46, %c0_47, %c0_48] : memref<4x1x8xf32, #tpu.memory_space<vmem>>, vector<1x1x8xf32>
    %57 = vector.shape_cast %56 : vector<1x1x8xf32> to vector<1x8xf32>
    %58 = vector.broadcast %57 : vector<1x8xf32> to vector<8x8xf32>
    %59 = arith.addf %55, %58 : vector<8x8xf32>
    %c1_49 = arith.constant 1 : index
    %c0_50 = arith.constant 0 : index
    %c0_51 = arith.constant 0 : index
    %60 = vector.load %arg7[%c1_49, %c0_50, %c0_51] : memref<4x32x8xf32, #tpu.memory_space<vmem>>, vector<1x32x8xf32>
    %61 = vector.shape_cast %60 : vector<1x32x8xf32> to vector<32x8xf32>
    %cst_52 = arith.constant dense<0.000000e+00> : vector<8x8xf32>
    %62 = tpu.matmul %3, %61, %cst_52 {dimension_numbers = #tpu.dot_dimension_numbers<[1], [0], [0], [1], [0, 0, 1, 1], [], []>} : vector<8x32xf32>, vector<32x8xf32>, vector<8x8xf32> -> vector<8x8xf32>
    %c1_53 = arith.constant 1 : index
    %c0_54 = arith.constant 0 : index
    %c0_55 = arith.constant 0 : index
    %63 = vector.load %arg8[%c1_53, %c0_54, %c0_55] : memref<4x1x8xf32, #tpu.memory_space<vmem>>, vector<1x1x8xf32>
    %64 = vector.shape_cast %63 : vector<1x1x8xf32> to vector<1x8xf32>
    %65 = vector.broadcast %64 : vector<1x8xf32> to vector<8x8xf32>
    %66 = arith.addf %62, %65 : vector<8x8xf32>
    %cst_56 = arith.constant dense<0.000000e+00> : vector<8x8xf32>
    %67 = tpu.matmul %52, %59, %cst_56 {dimension_numbers = #tpu.dot_dimension_numbers<[1], [1], [0], [0], [0, 0, 1, 0], [], []>} : vector<8x8xf32>, vector<8x8xf32>, vector<8x8xf32> -> vector<8x8xf32>
    %cst_57 = arith.constant dense<0xFF800000> : vector<8xf32>
    %68 = vector.multi_reduction <maximumf>, %67, %cst_57 [1] : vector<8x8xf32> to vector<8xf32>
    %69 = vector.shape_cast %68 : vector<8xf32> to vector<8x1xf32>
    %70 = vector.broadcast %69 : vector<8x1xf32> to vector<8x8xf32>
    %71 = arith.subf %67, %70 : vector<8x8xf32>
    %72 = math.exp %71 : vector<8x8xf32>
    %cst_58 = arith.constant dense<0.000000e+00> : vector<8xf32>
    %73 = vector.multi_reduction <add>, %72, %cst_58 [1] : vector<8x8xf32> to vector<8xf32>
    %74 = vector.shape_cast %73 : vector<8xf32> to vector<8x1xf32>
    %75 = tpu.reciprocal %74 {approx = true} : vector<8x1xf32> -> vector<8x1xf32>
    %76 = vector.broadcast %75 : vector<8x1xf32> to vector<8x8xf32>
    %77 = arith.mulf %72, %76 : vector<8x8xf32>
    %cst_59 = arith.constant dense<0.000000e+00> : vector<8x8xf32>
    %78 = tpu.matmul %77, %66, %cst_59 {dimension_numbers = #tpu.dot_dimension_numbers<[1], [0], [0], [1], [0, 0, 1, 1], [], []>} : vector<8x8xf32>, vector<8x8xf32>, vector<8x8xf32> -> vector<8x8xf32>
    %c1_60 = arith.constant 1 : index
    %c0_61 = arith.constant 0 : index
    %c0_62 = arith.constant 0 : index
    %79 = vector.load %arg9[%c1_60, %c0_61, %c0_62] : memref<4x8x32xf32, #tpu.memory_space<vmem>>, vector<1x8x32xf32>
    %80 = vector.shape_cast %79 : vector<1x8x32xf32> to vector<8x32xf32>
    %cst_63 = arith.constant dense<0.000000e+00> : vector<8x32xf32>
    %81 = tpu.matmul %78, %80, %cst_63 {dimension_numbers = #tpu.dot_dimension_numbers<[1], [0], [0], [1], [0, 0, 1, 1], [], []>} : vector<8x8xf32>, vector<8x32xf32>, vector<8x32xf32> -> vector<8x32xf32>
    %82 = arith.addf %43, %81 : vector<8x32xf32>
    %c2 = arith.constant 2 : index
    %c0_64 = arith.constant 0 : index
    %c0_65 = arith.constant 0 : index
    %83 = vector.load %arg3[%c2, %c0_64, %c0_65] : memref<4x32x8xf32, #tpu.memory_space<vmem>>, vector<1x32x8xf32>
    %84 = vector.shape_cast %83 : vector<1x32x8xf32> to vector<32x8xf32>
    %cst_66 = arith.constant dense<0.000000e+00> : vector<8x8xf32>
    %85 = tpu.matmul %1, %84, %cst_66 {dimension_numbers = #tpu.dot_dimension_numbers<[1], [0], [0], [1], [0, 0, 1, 1], [], []>} : vector<8x32xf32>, vector<32x8xf32>, vector<8x8xf32> -> vector<8x8xf32>
    %c2_67 = arith.constant 2 : index
    %c0_68 = arith.constant 0 : index
    %c0_69 = arith.constant 0 : index
    %86 = vector.load %arg4[%c2_67, %c0_68, %c0_69] : memref<4x1x8xf32, #tpu.memory_space<vmem>>, vector<1x1x8xf32>
    %87 = vector.shape_cast %86 : vector<1x1x8xf32> to vector<1x8xf32>
    %88 = vector.broadcast %87 : vector<1x8xf32> to vector<8x8xf32>
    %89 = arith.addf %85, %88 : vector<8x8xf32>
    %cst_70 = arith.constant 0.353553385 : f32
    %90 = vector.broadcast %cst_70 : f32 to vector<8x8xf32>
    %91 = arith.mulf %89, %90 : vector<8x8xf32>
    %c2_71 = arith.constant 2 : index
    %c0_72 = arith.constant 0 : index
    %c0_73 = arith.constant 0 : index
    %92 = vector.load %arg5[%c2_71, %c0_72, %c0_73] : memref<4x32x8xf32, #tpu.memory_space<vmem>>, vector<1x32x8xf32>
    %93 = vector.shape_cast %92 : vector<1x32x8xf32> to vector<32x8xf32>
    %cst_74 = arith.constant dense<0.000000e+00> : vector<8x8xf32>
    %94 = tpu.matmul %3, %93, %cst_74 {dimension_numbers = #tpu.dot_dimension_numbers<[1], [0], [0], [1], [0, 0, 1, 1], [], []>} : vector<8x32xf32>, vector<32x8xf32>, vector<8x8xf32> -> vector<8x8xf32>
    %c2_75 = arith.constant 2 : index
    %c0_76 = arith.constant 0 : index
    %c0_77 = arith.constant 0 : index
    %95 = vector.load %arg6[%c2_75, %c0_76, %c0_77] : memref<4x1x8xf32, #tpu.memory_space<vmem>>, vector<1x1x8xf32>
    %96 = vector.shape_cast %95 : vector<1x1x8xf32> to vector<1x8xf32>
    %97 = vector.broadcast %96 : vector<1x8xf32> to vector<8x8xf32>
    %98 = arith.addf %94, %97 : vector<8x8xf32>
    %c2_78 = arith.constant 2 : index
    %c0_79 = arith.constant 0 : index
    %c0_80 = arith.constant 0 : index
    %99 = vector.load %arg7[%c2_78, %c0_79, %c0_80] : memref<4x32x8xf32, #tpu.memory_space<vmem>>, vector<1x32x8xf32>
    %100 = vector.shape_cast %99 : vector<1x32x8xf32> to vector<32x8xf32>
    %cst_81 = arith.constant dense<0.000000e+00> : vector<8x8xf32>
    %101 = tpu.matmul %3, %100, %cst_81 {dimension_numbers = #tpu.dot_dimension_numbers<[1], [0], [0], [1], [0, 0, 1, 1], [], []>} : vector<8x32xf32>, vector<32x8xf32>, vector<8x8xf32> -> vector<8x8xf32>
    %c2_82 = arith.constant 2 : index
    %c0_83 = arith.constant 0 : index
    %c0_84 = arith.constant 0 : index
    %102 = vector.load %arg8[%c2_82, %c0_83, %c0_84] : memref<4x1x8xf32, #tpu.memory_space<vmem>>, vector<1x1x8xf32>
    %103 = vector.shape_cast %102 : vector<1x1x8xf32> to vector<1x8xf32>
    %104 = vector.broadcast %103 : vector<1x8xf32> to vector<8x8xf32>
    %105 = arith.addf %101, %104 : vector<8x8xf32>
    %cst_85 = arith.constant dense<0.000000e+00> : vector<8x8xf32>
    %106 = tpu.matmul %91, %98, %cst_85 {dimension_numbers = #tpu.dot_dimension_numbers<[1], [1], [0], [0], [0, 0, 1, 0], [], []>} : vector<8x8xf32>, vector<8x8xf32>, vector<8x8xf32> -> vector<8x8xf32>
    %cst_86 = arith.constant dense<0xFF800000> : vector<8xf32>
    %107 = vector.multi_reduction <maximumf>, %106, %cst_86 [1] : vector<8x8xf32> to vector<8xf32>
    %108 = vector.shape_cast %107 : vector<8xf32> to vector<8x1xf32>
    %109 = vector.broadcast %108 : vector<8x1xf32> to vector<8x8xf32>
    %110 = arith.subf %106, %109 : vector<8x8xf32>
    %111 = math.exp %110 : vector<8x8xf32>
    %cst_87 = arith.constant dense<0.000000e+00> : vector<8xf32>
    %112 = vector.multi_reduction <add>, %111, %cst_87 [1] : vector<8x8xf32> to vector<8xf32>
    %113 = vector.shape_cast %112 : vector<8xf32> to vector<8x1xf32>
    %114 = tpu.reciprocal %113 {approx = true} : vector<8x1xf32> -> vector<8x1xf32>
    %115 = vector.broadcast %114 : vector<8x1xf32> to vector<8x8xf32>
    %116 = arith.mulf %111, %115 : vector<8x8xf32>
    %cst_88 = arith.constant dense<0.000000e+00> : vector<8x8xf32>
    %117 = tpu.matmul %116, %105, %cst_88 {dimension_numbers = #tpu.dot_dimension_numbers<[1], [0], [0], [1], [0, 0, 1, 1], [], []>} : vector<8x8xf32>, vector<8x8xf32>, vector<8x8xf32> -> vector<8x8xf32>
    %c2_89 = arith.constant 2 : index
    %c0_90 = arith.constant 0 : index
    %c0_91 = arith.constant 0 : index
    %118 = vector.load %arg9[%c2_89, %c0_90, %c0_91] : memref<4x8x32xf32, #tpu.memory_space<vmem>>, vector<1x8x32xf32>
    %119 = vector.shape_cast %118 : vector<1x8x32xf32> to vector<8x32xf32>
    %cst_92 = arith.constant dense<0.000000e+00> : vector<8x32xf32>
    %120 = tpu.matmul %117, %119, %cst_92 {dimension_numbers = #tpu.dot_dimension_numbers<[1], [0], [0], [1], [0, 0, 1, 1], [], []>} : vector<8x8xf32>, vector<8x32xf32>, vector<8x32xf32> -> vector<8x32xf32>
    %121 = arith.addf %82, %120 : vector<8x32xf32>
    %c3 = arith.constant 3 : index
    %c0_93 = arith.constant 0 : index
    %c0_94 = arith.constant 0 : index
    %122 = vector.load %arg3[%c3, %c0_93, %c0_94] : memref<4x32x8xf32, #tpu.memory_space<vmem>>, vector<1x32x8xf32>
    %123 = vector.shape_cast %122 : vector<1x32x8xf32> to vector<32x8xf32>
    %cst_95 = arith.constant dense<0.000000e+00> : vector<8x8xf32>
    %124 = tpu.matmul %1, %123, %cst_95 {dimension_numbers = #tpu.dot_dimension_numbers<[1], [0], [0], [1], [0, 0, 1, 1], [], []>} : vector<8x32xf32>, vector<32x8xf32>, vector<8x8xf32> -> vector<8x8xf32>
    %c3_96 = arith.constant 3 : index
    %c0_97 = arith.constant 0 : index
    %c0_98 = arith.constant 0 : index
    %125 = vector.load %arg4[%c3_96, %c0_97, %c0_98] : memref<4x1x8xf32, #tpu.memory_space<vmem>>, vector<1x1x8xf32>
    %126 = vector.shape_cast %125 : vector<1x1x8xf32> to vector<1x8xf32>
    %127 = vector.broadcast %126 : vector<1x8xf32> to vector<8x8xf32>
    %128 = arith.addf %124, %127 : vector<8x8xf32>
    %cst_99 = arith.constant 0.353553385 : f32
    %129 = vector.broadcast %cst_99 : f32 to vector<8x8xf32>
    %130 = arith.mulf %128, %129 : vector<8x8xf32>
    %c3_100 = arith.constant 3 : index
    %c0_101 = arith.constant 0 : index
    %c0_102 = arith.constant 0 : index
    %131 = vector.load %arg5[%c3_100, %c0_101, %c0_102] : memref<4x32x8xf32, #tpu.memory_space<vmem>>, vector<1x32x8xf32>
    %132 = vector.shape_cast %131 : vector<1x32x8xf32> to vector<32x8xf32>
    %cst_103 = arith.constant dense<0.000000e+00> : vector<8x8xf32>
    %133 = tpu.matmul %3, %132, %cst_103 {dimension_numbers = #tpu.dot_dimension_numbers<[1], [0], [0], [1], [0, 0, 1, 1], [], []>} : vector<8x32xf32>, vector<32x8xf32>, vector<8x8xf32> -> vector<8x8xf32>
    %c3_104 = arith.constant 3 : index
    %c0_105 = arith.constant 0 : index
    %c0_106 = arith.constant 0 : index
    %134 = vector.load %arg6[%c3_104, %c0_105, %c0_106] : memref<4x1x8xf32, #tpu.memory_space<vmem>>, vector<1x1x8xf32>
    %135 = vector.shape_cast %134 : vector<1x1x8xf32> to vector<1x8xf32>
    %136 = vector.broadcast %135 : vector<1x8xf32> to vector<8x8xf32>
    %137 = arith.addf %133, %136 : vector<8x8xf32>
    %c3_107 = arith.constant 3 : index
    %c0_108 = arith.constant 0 : index
    %c0_109 = arith.constant 0 : index
    %138 = vector.load %arg7[%c3_107, %c0_108, %c0_109] : memref<4x32x8xf32, #tpu.memory_space<vmem>>, vector<1x32x8xf32>
    %139 = vector.shape_cast %138 : vector<1x32x8xf32> to vector<32x8xf32>
    %cst_110 = arith.constant dense<0.000000e+00> : vector<8x8xf32>
    %140 = tpu.matmul %3, %139, %cst_110 {dimension_numbers = #tpu.dot_dimension_numbers<[1], [0], [0], [1], [0, 0, 1, 1], [], []>} : vector<8x32xf32>, vector<32x8xf32>, vector<8x8xf32> -> vector<8x8xf32>
    %c3_111 = arith.constant 3 : index
    %c0_112 = arith.constant 0 : index
    %c0_113 = arith.constant 0 : index
    %141 = vector.load %arg8[%c3_111, %c0_112, %c0_113] : memref<4x1x8xf32, #tpu.memory_space<vmem>>, vector<1x1x8xf32>
    %142 = vector.shape_cast %141 : vector<1x1x8xf32> to vector<1x8xf32>
    %143 = vector.broadcast %142 : vector<1x8xf32> to vector<8x8xf32>
    %144 = arith.addf %140, %143 : vector<8x8xf32>
    %cst_114 = arith.constant dense<0.000000e+00> : vector<8x8xf32>
    %145 = tpu.matmul %130, %137, %cst_114 {dimension_numbers = #tpu.dot_dimension_numbers<[1], [1], [0], [0], [0, 0, 1, 0], [], []>} : vector<8x8xf32>, vector<8x8xf32>, vector<8x8xf32> -> vector<8x8xf32>
    %cst_115 = arith.constant dense<0xFF800000> : vector<8xf32>
    %146 = vector.multi_reduction <maximumf>, %145, %cst_115 [1] : vector<8x8xf32> to vector<8xf32>
    %147 = vector.shape_cast %146 : vector<8xf32> to vector<8x1xf32>
    %148 = vector.broadcast %147 : vector<8x1xf32> to vector<8x8xf32>
    %149 = arith.subf %145, %148 : vector<8x8xf32>
    %150 = math.exp %149 : vector<8x8xf32>
    %cst_116 = arith.constant dense<0.000000e+00> : vector<8xf32>
    %151 = vector.multi_reduction <add>, %150, %cst_116 [1] : vector<8x8xf32> to vector<8xf32>
    %152 = vector.shape_cast %151 : vector<8xf32> to vector<8x1xf32>
    %153 = tpu.reciprocal %152 {approx = true} : vector<8x1xf32> -> vector<8x1xf32>
    %154 = vector.broadcast %153 : vector<8x1xf32> to vector<8x8xf32>
    %155 = arith.mulf %150, %154 : vector<8x8xf32>
    %cst_117 = arith.constant dense<0.000000e+00> : vector<8x8xf32>
    %156 = tpu.matmul %155, %144, %cst_117 {dimension_numbers = #tpu.dot_dimension_numbers<[1], [0], [0], [1], [0, 0, 1, 1], [], []>} : vector<8x8xf32>, vector<8x8xf32>, vector<8x8xf32> -> vector<8x8xf32>
    %c3_118 = arith.constant 3 : index
    %c0_119 = arith.constant 0 : index
    %c0_120 = arith.constant 0 : index
    %157 = vector.load %arg9[%c3_118, %c0_119, %c0_120] : memref<4x8x32xf32, #tpu.memory_space<vmem>>, vector<1x8x32xf32>
    %158 = vector.shape_cast %157 : vector<1x8x32xf32> to vector<8x32xf32>
    %cst_121 = arith.constant dense<0.000000e+00> : vector<8x32xf32>
    %159 = tpu.matmul %156, %158, %cst_121 {dimension_numbers = #tpu.dot_dimension_numbers<[1], [0], [0], [1], [0, 0, 1, 1], [], []>} : vector<8x8xf32>, vector<8x32xf32>, vector<8x32xf32> -> vector<8x32xf32>
    %160 = arith.addf %121, %159 : vector<8x32xf32>
    %161 = arith.addf %1, %160 : vector<8x32xf32>
    %c0_122 = arith.constant 0 : index
    %c0_123 = arith.constant 0 : index
    %162 = vector.load %arg10[%c0_122, %c0_123] : memref<1x32xf32, #tpu.memory_space<vmem>>, vector<1x32xf32>
    %163 = vector.broadcast %162 : vector<1x32xf32> to vector<8x32xf32>
    %164 = arith.addf %161, %163 : vector<8x32xf32>
    %cst_124 = arith.constant dense<0.000000e+00> : vector<8xf32>
    %165 = vector.multi_reduction <add>, %164, %cst_124 [1] : vector<8x32xf32> to vector<8xf32>
    %166 = vector.shape_cast %165 : vector<8xf32> to vector<8x1xf32>
    %cst_125 = arith.constant 3.200000e+01 : f32
    %167 = vector.broadcast %cst_125 : f32 to vector<8x1xf32>
    %168 = arith.divf %166, %167 : vector<8x1xf32>
    %169 = vector.broadcast %168 : vector<8x1xf32> to vector<8x32xf32>
    %170 = arith.subf %164, %169 : vector<8x32xf32>
    %171 = arith.mulf %170, %170 : vector<8x32xf32>
    %cst_126 = arith.constant dense<0.000000e+00> : vector<8xf32>
    %172 = vector.multi_reduction <add>, %171, %cst_126 [1] : vector<8x32xf32> to vector<8xf32>
    %173 = vector.shape_cast %172 : vector<8xf32> to vector<8x1xf32>
    %cst_127 = arith.constant 3.200000e+01 : f32
    %174 = vector.broadcast %cst_127 : f32 to vector<8x1xf32>
    %175 = arith.divf %173, %174 : vector<8x1xf32>
    %176 = vector.broadcast %168 : vector<8x1xf32> to vector<8x32xf32>
    %177 = arith.subf %164, %176 : vector<8x32xf32>
    %cst_128 = arith.constant 9.99999974E-6 : f32
    %178 = vector.broadcast %cst_128 : f32 to vector<8x1xf32>
    %179 = arith.addf %175, %178 : vector<8x1xf32>
    %180 = math.rsqrt %179 : vector<8x1xf32>
    %181 = vector.broadcast %180 : vector<8x1xf32> to vector<8x32xf32>
    %182 = arith.mulf %177, %181 : vector<8x32xf32>
    %c0_129 = arith.constant 0 : index
    %c0_130 = arith.constant 0 : index
    %183 = vector.load %arg11[%c0_129, %c0_130] : memref<1x32xf32, #tpu.memory_space<vmem>>, vector<1x32xf32>
    %184 = vector.broadcast %183 : vector<1x32xf32> to vector<8x32xf32>
    %185 = arith.mulf %182, %184 : vector<8x32xf32>
    %c0_131 = arith.constant 0 : index
    %c0_132 = arith.constant 0 : index
    %186 = vector.load %arg12[%c0_131, %c0_132] : memref<1x32xf32, #tpu.memory_space<vmem>>, vector<1x32xf32>
    %187 = vector.broadcast %186 : vector<1x32xf32> to vector<8x32xf32>
    %188 = arith.addf %185, %187 : vector<8x32xf32>
    %c0_133 = arith.constant 0 : index
    %c0_134 = arith.constant 0 : index
    %c0_135 = arith.constant 0 : index
    %189 = vector.load %arg13[%c0_133, %c0_134, %c0_135] : memref<1x8x32xf32, #tpu.memory_space<vmem>>, vector<1x8x32xf32>
    %190 = vector.shape_cast %189 : vector<1x8x32xf32> to vector<8x32xf32>
    %191 = vector.shape_cast %188 : vector<8x32xf32> to vector<1x8x32xf32>
    tpu.vector_store %arg13[%c0_133, %c0_134, %c0_135], %191 {strides = array<i32>} : memref<1x8x32xf32, #tpu.memory_space<vmem>>, vector<1x8x32xf32>,
    return
  }
  func.func @transform_0(%arg0: i32) -> (i32, i32, i32) {
    %c0_i32 = arith.constant 0 : i32
    %c0_i32_0 = arith.constant 0 : i32
    %c0_i32_1 = arith.constant 0 : i32
    return %arg0, %c0_i32, %c0_i32_0 : i32, i32, i32
  }
  func.func @transform_1(%arg0: i32) -> (i32, i32, i32) {
    %c0_i32 = arith.constant 0 : i32
    %c0_i32_0 = arith.constant 0 : i32
    %c0_i32_1 = arith.constant 0 : i32
    return %arg0, %c0_i32, %c0_i32_0 : i32, i32, i32
  }
  func.func @transform_2(%arg0: i32) -> (i32, i32, i32) {
    %c0_i32 = arith.constant 0 : i32
    %c0_i32_0 = arith.constant 0 : i32
    %c0_i32_1 = arith.constant 0 : i32
    %c0_i32_2 = arith.constant 0 : i32
    return %c0_i32, %c0_i32_0, %c0_i32_1 : i32, i32, i32
  }
  func.func @transform_3(%arg0: i32) -> (i32, i32, i32) {
    %c0_i32 = arith.constant 0 : i32
    %c0_i32_0 = arith.constant 0 : i32
    %c0_i32_1 = arith.constant 0 : i32
    %c0_i32_2 = arith.constant 0 : i32
    return %c0_i32, %c0_i32_0, %c0_i32_1 : i32, i32, i32
  }
  func.func @transform_4(%arg0: i32) -> (i32, i32, i32) {
    %c0_i32 = arith.constant 0 : i32
    %c0_i32_0 = arith.constant 0 : i32
    %c0_i32_1 = arith.constant 0 : i32
    %c0_i32_2 = arith.constant 0 : i32
    return %c0_i32, %c0_i32_0, %c0_i32_1 : i32, i32, i32
  }
  func.func @transform_5(%arg0: i32) -> (i32, i32, i32) {
    %c0_i32 = arith.constant 0 : i32
    %c0_i32_0 = arith.constant 0 : i32
    %c0_i32_1 = arith.constant 0 : i32
    %c0_i32_2 = arith.constant 0 : i32
    return %c0_i32, %c0_i32_0, %c0_i32_1 : i32, i32, i32
  }
  func.func @transform_6(%arg0: i32) -> (i32, i32, i32) {
    %c0_i32 = arith.constant 0 : i32
    %c0_i32_0 = arith.constant 0 : i32
    %c0_i32_1 = arith.constant 0 : i32
    %c0_i32_2 = arith.constant 0 : i32
    return %c0_i32, %c0_i32_0, %c0_i32_1 : i32, i32, i32
  }
  func.func @transform_7(%arg0: i32) -> (i32, i32, i32) {
    %c0_i32 = arith.constant 0 : i32
    %c0_i32_0 = arith.constant 0 : i32
    %c0_i32_1 = arith.constant 0 : i32
    %c0_i32_2 = arith.constant 0 : i32
    return %c0_i32, %c0_i32_0, %c0_i32_1 : i32, i32, i32
  }
  func.func @transform_8(%arg0: i32) -> (i32, i32, i32) {
    %c0_i32 = arith.constant 0 : i32
    %c0_i32_0 = arith.constant 0 : i32
    %c0_i32_1 = arith.constant 0 : i32
    %c0_i32_2 = arith.constant 0 : i32
    return %c0_i32, %c0_i32_0, %c0_i32_1 : i32, i32, i32
  }
  func.func @transform_9(%arg0: i32) -> (i32, i32) {
    %c0_i32 = arith.constant 0 : i32
    %c0_i32_0 = arith.constant 0 : i32
    %c0_i32_1 = arith.constant 0 : i32
    return %c0_i32, %c0_i32_0 : i32, i32
  }
  func.func @transform_10(%arg0: i32) -> (i32, i32) {
    %c0_i32 = arith.constant 0 : i32
    %c0_i32_0 = arith.constant 0 : i32
    %c0_i32_1 = arith.constant 0 : i32
    return %c0_i32, %c0_i32_0 : i32, i32
  }
  func.func @transform_11(%arg0: i32) -> (i32, i32) {
    %c0_i32 = arith.constant 0 : i32
    %c0_i32_0 = arith.constant 0 : i32
    %c0_i32_1 = arith.constant 0 : i32
    return %c0_i32, %c0_i32_0 : i32, i32
  }
  func.func @transform_12(%arg0: i32) -> (i32, i32, i32) {
    %c0_i32 = arith.constant 0 : i32
    %c0_i32_0 = arith.constant 0 : i32
    %c0_i32_1 = arith.constant 0 : i32
    return %arg0, %c0_i32, %c0_i32_0 : i32, i32, i32
  }
}

module attributes {stable_mosaic.version = 11 : i64} {
  func.func @_ln_kernel(%arg0: i32, %arg1: memref<16x32xf32, #tpu.memory_space<vmem>>, %arg2: memref<1x32xf32, #tpu.memory_space<vmem>>, %arg3: memref<1x32xf32, #tpu.memory_space<vmem>>, %arg4: memref<16x32xf32, #tpu.memory_space<vmem>>) attributes {dimension_semantics = [#tpu.dimension_semantics<arbitrary>], iteration_bounds = array<i64: 1>, scalar_prefetch = 0 : i64, scratch_operands = 0 : i64, tpu.core_type = #tpu.core_type<tc>, window_params = [{pipeline_mode = #tpu.pipeline_mode<synchronous>, transform_indices = @transform_0, window_bounds = array<i64: 16, 32>}, {pipeline_mode = #tpu.pipeline_mode<synchronous>, transform_indices = @transform_1, window_bounds = array<i64: 1, 32>}, {pipeline_mode = #tpu.pipeline_mode<synchronous>, transform_indices = @transform_2, window_bounds = array<i64: 1, 32>}, {pipeline_mode = #tpu.pipeline_mode<synchronous>, transform_indices = @transform_3, window_bounds = array<i64: 16, 32>}]} {
    %c0 = arith.constant 0 : index
    %c0_0 = arith.constant 0 : index
    %0 = vector.load %arg1[%c0, %c0_0] : memref<16x32xf32, #tpu.memory_space<vmem>>, vector<16x32xf32>
    %cst = arith.constant dense<0.000000e+00> : vector<16xf32>
    %1 = vector.multi_reduction <add>, %0, %cst [1] : vector<16x32xf32> to vector<16xf32>
    %2 = vector.shape_cast %1 : vector<16xf32> to vector<16x1xf32>
    %cst_1 = arith.constant 3.200000e+01 : f32
    %3 = vector.broadcast %cst_1 : f32 to vector<16x1xf32>
    %4 = arith.divf %2, %3 : vector<16x1xf32>
    %5 = vector.broadcast %4 : vector<16x1xf32> to vector<16x32xf32>
    %6 = arith.subf %0, %5 : vector<16x32xf32>
    %7 = arith.mulf %6, %6 : vector<16x32xf32>
    %cst_2 = arith.constant dense<0.000000e+00> : vector<16xf32>
    %8 = vector.multi_reduction <add>, %7, %cst_2 [1] : vector<16x32xf32> to vector<16xf32>
    %9 = vector.shape_cast %8 : vector<16xf32> to vector<16x1xf32>
    %cst_3 = arith.constant 3.200000e+01 : f32
    %10 = vector.broadcast %cst_3 : f32 to vector<16x1xf32>
    %11 = arith.divf %9, %10 : vector<16x1xf32>
    %12 = vector.broadcast %4 : vector<16x1xf32> to vector<16x32xf32>
    %13 = arith.subf %0, %12 : vector<16x32xf32>
    %cst_4 = arith.constant 9.99999974E-6 : f32
    %14 = vector.broadcast %cst_4 : f32 to vector<16x1xf32>
    %15 = arith.addf %11, %14 : vector<16x1xf32>
    %16 = math.rsqrt %15 : vector<16x1xf32>
    %17 = vector.broadcast %16 : vector<16x1xf32> to vector<16x32xf32>
    %18 = arith.mulf %13, %17 : vector<16x32xf32>
    %c0_5 = arith.constant 0 : index
    %c0_6 = arith.constant 0 : index
    %19 = vector.load %arg2[%c0_5, %c0_6] : memref<1x32xf32, #tpu.memory_space<vmem>>, vector<1x32xf32>
    %20 = vector.broadcast %19 : vector<1x32xf32> to vector<16x32xf32>
    %21 = arith.mulf %18, %20 : vector<16x32xf32>
    %c0_7 = arith.constant 0 : index
    %c0_8 = arith.constant 0 : index
    %22 = vector.load %arg3[%c0_7, %c0_8] : memref<1x32xf32, #tpu.memory_space<vmem>>, vector<1x32xf32>
    %23 = vector.broadcast %22 : vector<1x32xf32> to vector<16x32xf32>
    %24 = arith.addf %21, %23 : vector<16x32xf32>
    %c0_9 = arith.constant 0 : index
    %c0_10 = arith.constant 0 : index
    %25 = vector.load %arg4[%c0_9, %c0_10] : memref<16x32xf32, #tpu.memory_space<vmem>>, vector<16x32xf32>
    tpu.vector_store %arg4[%c0_9, %c0_10], %24 {strides = array<i32>} : memref<16x32xf32, #tpu.memory_space<vmem>>, vector<16x32xf32>,
    return
  }
  func.func @transform_0(%arg0: i32) -> (i32, i32) {
    %c0_i32 = arith.constant 0 : i32
    %c0_i32_0 = arith.constant 0 : i32
    %c0_i32_1 = arith.constant 0 : i32
    return %c0_i32, %c0_i32_0 : i32, i32
  }
  func.func @transform_1(%arg0: i32) -> (i32, i32) {
    %c0_i32 = arith.constant 0 : i32
    %c0_i32_0 = arith.constant 0 : i32
    %c0_i32_1 = arith.constant 0 : i32
    return %c0_i32, %c0_i32_0 : i32, i32
  }
  func.func @transform_2(%arg0: i32) -> (i32, i32) {
    %c0_i32 = arith.constant 0 : i32
    %c0_i32_0 = arith.constant 0 : i32
    %c0_i32_1 = arith.constant 0 : i32
    return %c0_i32, %c0_i32_0 : i32, i32
  }
  func.func @transform_3(%arg0: i32) -> (i32, i32) {
    %c0_i32 = arith.constant 0 : i32
    %c0_i32_0 = arith.constant 0 : i32
    %c0_i32_1 = arith.constant 0 : i32
    return %c0_i32, %c0_i32_0 : i32, i32
  }
}

module attributes {stable_mosaic.version = 11 : i64} {
  func.func @_ffn_ln_kernel(%arg0: i32, %arg1: memref<1x8x32xf32, #tpu.memory_space<vmem>>, %arg2: memref<32x64xf32, #tpu.memory_space<vmem>>, %arg3: memref<1x64xf32, #tpu.memory_space<vmem>>, %arg4: memref<64x32xf32, #tpu.memory_space<vmem>>, %arg5: memref<1x32xf32, #tpu.memory_space<vmem>>, %arg6: memref<1x32xf32, #tpu.memory_space<vmem>>, %arg7: memref<1x32xf32, #tpu.memory_space<vmem>>, %arg8: memref<1x8x32xf32, #tpu.memory_space<vmem>>) attributes {dimension_semantics = [#tpu.dimension_semantics<parallel>], iteration_bounds = array<i64: 2>, scalar_prefetch = 0 : i64, scratch_operands = 0 : i64, tpu.core_type = #tpu.core_type<tc>, window_params = [{transform_indices = @transform_0, window_bounds = array<i64: 1, 8, 32>}, {pipeline_mode = #tpu.pipeline_mode<synchronous>, transform_indices = @transform_1, window_bounds = array<i64: 32, 64>}, {pipeline_mode = #tpu.pipeline_mode<synchronous>, transform_indices = @transform_2, window_bounds = array<i64: 1, 64>}, {pipeline_mode = #tpu.pipeline_mode<synchronous>, transform_indices = @transform_3, window_bounds = array<i64: 64, 32>}, {pipeline_mode = #tpu.pipeline_mode<synchronous>, transform_indices = @transform_4, window_bounds = array<i64: 1, 32>}, {pipeline_mode = #tpu.pipeline_mode<synchronous>, transform_indices = @transform_5, window_bounds = array<i64: 1, 32>}, {pipeline_mode = #tpu.pipeline_mode<synchronous>, transform_indices = @transform_6, window_bounds = array<i64: 1, 32>}, {transform_indices = @transform_7, window_bounds = array<i64: 1, 8, 32>}]} {
    %c0 = arith.constant 0 : index
    %c0_0 = arith.constant 0 : index
    %c0_1 = arith.constant 0 : index
    %0 = vector.load %arg1[%c0, %c0_0, %c0_1] : memref<1x8x32xf32, #tpu.memory_space<vmem>>, vector<1x8x32xf32>
    %1 = vector.shape_cast %0 : vector<1x8x32xf32> to vector<8x32xf32>
    %c0_2 = arith.constant 0 : index
    %c0_3 = arith.constant 0 : index
    %2 = vector.load %arg2[%c0_2, %c0_3] : memref<32x64xf32, #tpu.memory_space<vmem>>, vector<32x64xf32>
    %cst = arith.constant dense<0.000000e+00> : vector<8x64xf32>
    %3 = tpu.matmul %1, %2, %cst {dimension_numbers = #tpu.dot_dimension_numbers<[1], [0], [0], [1], [0, 0, 1, 1], [], []>} : vector<8x32xf32>, vector<32x64xf32>, vector<8x64xf32> -> vector<8x64xf32>
    %c0_4 = arith.constant 0 : index
    %c0_5 = arith.constant 0 : index
    %4 = vector.load %arg3[%c0_4, %c0_5] : memref<1x64xf32, #tpu.memory_space<vmem>>, vector<1x64xf32>
    %5 = vector.broadcast %4 : vector<1x64xf32> to vector<8x64xf32>
    %6 = arith.addf %3, %5 : vector<8x64xf32>
    %cst_6 = arith.constant 0.000000e+00 : f32
    %7 = vector.broadcast %cst_6 : f32 to vector<8x64xf32>
    %8 = arith.maximumf %6, %7 : vector<8x64xf32>
    %c0_7 = arith.constant 0 : index
    %c0_8 = arith.constant 0 : index
    %9 = vector.load %arg4[%c0_7, %c0_8] : memref<64x32xf32, #tpu.memory_space<vmem>>, vector<64x32xf32>
    %cst_9 = arith.constant dense<0.000000e+00> : vector<8x32xf32>
    %10 = tpu.matmul %8, %9, %cst_9 {dimension_numbers = #tpu.dot_dimension_numbers<[1], [0], [0], [1], [0, 0, 1, 1], [], []>} : vector<8x64xf32>, vector<64x32xf32>, vector<8x32xf32> -> vector<8x32xf32>
    %c0_10 = arith.constant 0 : index
    %c0_11 = arith.constant 0 : index
    %11 = vector.load %arg5[%c0_10, %c0_11] : memref<1x32xf32, #tpu.memory_space<vmem>>, vector<1x32xf32>
    %12 = vector.broadcast %11 : vector<1x32xf32> to vector<8x32xf32>
    %13 = arith.addf %10, %12 : vector<8x32xf32>
    %14 = arith.addf %1, %13 : vector<8x32xf32>
    %cst_12 = arith.constant dense<0.000000e+00> : vector<8xf32>
    %15 = vector.multi_reduction <add>, %14, %cst_12 [1] : vector<8x32xf32> to vector<8xf32>
    %16 = vector.shape_cast %15 : vector<8xf32> to vector<8x1xf32>
    %cst_13 = arith.constant 3.200000e+01 : f32
    %17 = vector.broadcast %cst_13 : f32 to vector<8x1xf32>
    %18 = arith.divf %16, %17 : vector<8x1xf32>
    %19 = vector.broadcast %18 : vector<8x1xf32> to vector<8x32xf32>
    %20 = arith.subf %14, %19 : vector<8x32xf32>
    %21 = arith.mulf %20, %20 : vector<8x32xf32>
    %cst_14 = arith.constant dense<0.000000e+00> : vector<8xf32>
    %22 = vector.multi_reduction <add>, %21, %cst_14 [1] : vector<8x32xf32> to vector<8xf32>
    %23 = vector.shape_cast %22 : vector<8xf32> to vector<8x1xf32>
    %cst_15 = arith.constant 3.200000e+01 : f32
    %24 = vector.broadcast %cst_15 : f32 to vector<8x1xf32>
    %25 = arith.divf %23, %24 : vector<8x1xf32>
    %26 = vector.broadcast %18 : vector<8x1xf32> to vector<8x32xf32>
    %27 = arith.subf %14, %26 : vector<8x32xf32>
    %cst_16 = arith.constant 9.99999974E-6 : f32
    %28 = vector.broadcast %cst_16 : f32 to vector<8x1xf32>
    %29 = arith.addf %25, %28 : vector<8x1xf32>
    %30 = math.rsqrt %29 : vector<8x1xf32>
    %31 = vector.broadcast %30 : vector<8x1xf32> to vector<8x32xf32>
    %32 = arith.mulf %27, %31 : vector<8x32xf32>
    %c0_17 = arith.constant 0 : index
    %c0_18 = arith.constant 0 : index
    %33 = vector.load %arg6[%c0_17, %c0_18] : memref<1x32xf32, #tpu.memory_space<vmem>>, vector<1x32xf32>
    %34 = vector.broadcast %33 : vector<1x32xf32> to vector<8x32xf32>
    %35 = arith.mulf %32, %34 : vector<8x32xf32>
    %c0_19 = arith.constant 0 : index
    %c0_20 = arith.constant 0 : index
    %36 = vector.load %arg7[%c0_19, %c0_20] : memref<1x32xf32, #tpu.memory_space<vmem>>, vector<1x32xf32>
    %37 = vector.broadcast %36 : vector<1x32xf32> to vector<8x32xf32>
    %38 = arith.addf %35, %37 : vector<8x32xf32>
    %c0_21 = arith.constant 0 : index
    %c0_22 = arith.constant 0 : index
    %c0_23 = arith.constant 0 : index
    %39 = vector.load %arg8[%c0_21, %c0_22, %c0_23] : memref<1x8x32xf32, #tpu.memory_space<vmem>>, vector<1x8x32xf32>
    %40 = vector.shape_cast %39 : vector<1x8x32xf32> to vector<8x32xf32>
    %41 = vector.shape_cast %38 : vector<8x32xf32> to vector<1x8x32xf32>
    tpu.vector_store %arg8[%c0_21, %c0_22, %c0_23], %41 {strides = array<i32>} : memref<1x8x32xf32, #tpu.memory_space<vmem>>, vector<1x8x32xf32>,
    return
  }
  func.func @transform_0(%arg0: i32) -> (i32, i32, i32) {
    %c0_i32 = arith.constant 0 : i32
    %c0_i32_0 = arith.constant 0 : i32
    %c0_i32_1 = arith.constant 0 : i32
    return %arg0, %c0_i32, %c0_i32_0 : i32, i32, i32
  }
  func.func @transform_1(%arg0: i32) -> (i32, i32) {
    %c0_i32 = arith.constant 0 : i32
    %c0_i32_0 = arith.constant 0 : i32
    %c0_i32_1 = arith.constant 0 : i32
    return %c0_i32, %c0_i32_0 : i32, i32
  }
  func.func @transform_2(%arg0: i32) -> (i32, i32) {
    %c0_i32 = arith.constant 0 : i32
    %c0_i32_0 = arith.constant 0 : i32
    %c0_i32_1 = arith.constant 0 : i32
    return %c0_i32, %c0_i32_0 : i32, i32
  }
  func.func @transform_3(%arg0: i32) -> (i32, i32) {
    %c0_i32 = arith.constant 0 : i32
    %c0_i32_0 = arith.constant 0 : i32
    %c0_i32_1 = arith.constant 0 : i32
    return %c0_i32, %c0_i32_0 : i32, i32
  }
  func.func @transform_4(%arg0: i32) -> (i32, i32) {
    %c0_i32 = arith.constant 0 : i32
    %c0_i32_0 = arith.constant 0 : i32
    %c0_i32_1 = arith.constant 0 : i32
    return %c0_i32, %c0_i32_0 : i32, i32
  }
  func.func @transform_5(%arg0: i32) -> (i32, i32) {
    %c0_i32 = arith.constant 0 : i32
    %c0_i32_0 = arith.constant 0 : i32
    %c0_i32_1 = arith.constant 0 : i32
    return %c0_i32, %c0_i32_0 : i32, i32
  }
  func.func @transform_6(%arg0: i32) -> (i32, i32) {
    %c0_i32 = arith.constant 0 : i32
    %c0_i32_0 = arith.constant 0 : i32
    %c0_i32_1 = arith.constant 0 : i32
    return %c0_i32, %c0_i32_0 : i32, i32
  }
  func.func @transform_7(%arg0: i32) -> (i32, i32, i32) {
    %c0_i32 = arith.constant 0 : i32
    %c0_i32_0 = arith.constant 0 : i32
    %c0_i32_1 = arith.constant 0 : i32
    return %arg0, %c0_i32, %c0_i32_0 : i32, i32, i32
  }
}

module attributes {stable_mosaic.version = 11 : i64} {
  func.func @_ln_head_kernel(%arg0: i32, %arg1: memref<16x32xf32, #tpu.memory_space<vmem>>, %arg2: memref<1x32xf32, #tpu.memory_space<vmem>>, %arg3: memref<1x32xf32, #tpu.memory_space<vmem>>, %arg4: memref<32x3xf32, #tpu.memory_space<vmem>>, %arg5: memref<1x3xf32, #tpu.memory_space<vmem>>, %arg6: memref<16x3xf32, #tpu.memory_space<vmem>>) attributes {dimension_semantics = [#tpu.dimension_semantics<arbitrary>], iteration_bounds = array<i64: 1>, scalar_prefetch = 0 : i64, scratch_operands = 0 : i64, tpu.core_type = #tpu.core_type<tc>, window_params = [{pipeline_mode = #tpu.pipeline_mode<synchronous>, transform_indices = @transform_0, window_bounds = array<i64: 16, 32>}, {pipeline_mode = #tpu.pipeline_mode<synchronous>, transform_indices = @transform_1, window_bounds = array<i64: 1, 32>}, {pipeline_mode = #tpu.pipeline_mode<synchronous>, transform_indices = @transform_2, window_bounds = array<i64: 1, 32>}, {pipeline_mode = #tpu.pipeline_mode<synchronous>, transform_indices = @transform_3, window_bounds = array<i64: 32, 3>}, {pipeline_mode = #tpu.pipeline_mode<synchronous>, transform_indices = @transform_4, window_bounds = array<i64: 1, 3>}, {pipeline_mode = #tpu.pipeline_mode<synchronous>, transform_indices = @transform_5, window_bounds = array<i64: 16, 3>}]} {
    %c0 = arith.constant 0 : index
    %c0_0 = arith.constant 0 : index
    %0 = vector.load %arg1[%c0, %c0_0] : memref<16x32xf32, #tpu.memory_space<vmem>>, vector<16x32xf32>
    %cst = arith.constant dense<0.000000e+00> : vector<16xf32>
    %1 = vector.multi_reduction <add>, %0, %cst [1] : vector<16x32xf32> to vector<16xf32>
    %2 = vector.shape_cast %1 : vector<16xf32> to vector<16x1xf32>
    %cst_1 = arith.constant 3.200000e+01 : f32
    %3 = vector.broadcast %cst_1 : f32 to vector<16x1xf32>
    %4 = arith.divf %2, %3 : vector<16x1xf32>
    %5 = vector.broadcast %4 : vector<16x1xf32> to vector<16x32xf32>
    %6 = arith.subf %0, %5 : vector<16x32xf32>
    %7 = arith.mulf %6, %6 : vector<16x32xf32>
    %cst_2 = arith.constant dense<0.000000e+00> : vector<16xf32>
    %8 = vector.multi_reduction <add>, %7, %cst_2 [1] : vector<16x32xf32> to vector<16xf32>
    %9 = vector.shape_cast %8 : vector<16xf32> to vector<16x1xf32>
    %cst_3 = arith.constant 3.200000e+01 : f32
    %10 = vector.broadcast %cst_3 : f32 to vector<16x1xf32>
    %11 = arith.divf %9, %10 : vector<16x1xf32>
    %12 = vector.broadcast %4 : vector<16x1xf32> to vector<16x32xf32>
    %13 = arith.subf %0, %12 : vector<16x32xf32>
    %cst_4 = arith.constant 9.99999974E-6 : f32
    %14 = vector.broadcast %cst_4 : f32 to vector<16x1xf32>
    %15 = arith.addf %11, %14 : vector<16x1xf32>
    %16 = math.rsqrt %15 : vector<16x1xf32>
    %17 = vector.broadcast %16 : vector<16x1xf32> to vector<16x32xf32>
    %18 = arith.mulf %13, %17 : vector<16x32xf32>
    %c0_5 = arith.constant 0 : index
    %c0_6 = arith.constant 0 : index
    %19 = vector.load %arg2[%c0_5, %c0_6] : memref<1x32xf32, #tpu.memory_space<vmem>>, vector<1x32xf32>
    %20 = vector.broadcast %19 : vector<1x32xf32> to vector<16x32xf32>
    %21 = arith.mulf %18, %20 : vector<16x32xf32>
    %c0_7 = arith.constant 0 : index
    %c0_8 = arith.constant 0 : index
    %22 = vector.load %arg3[%c0_7, %c0_8] : memref<1x32xf32, #tpu.memory_space<vmem>>, vector<1x32xf32>
    %23 = vector.broadcast %22 : vector<1x32xf32> to vector<16x32xf32>
    %24 = arith.addf %21, %23 : vector<16x32xf32>
    %c0_9 = arith.constant 0 : index
    %c0_10 = arith.constant 0 : index
    %25 = vector.load %arg4[%c0_9, %c0_10] : memref<32x3xf32, #tpu.memory_space<vmem>>, vector<32x3xf32>
    %cst_11 = arith.constant dense<0.000000e+00> : vector<16x3xf32>
    %26 = tpu.matmul %24, %25, %cst_11 {dimension_numbers = #tpu.dot_dimension_numbers<[1], [0], [0], [1], [0, 0, 1, 1], [], []>} : vector<16x32xf32>, vector<32x3xf32>, vector<16x3xf32> -> vector<16x3xf32>
    %c0_12 = arith.constant 0 : index
    %c0_13 = arith.constant 0 : index
    %27 = vector.load %arg5[%c0_12, %c0_13] : memref<1x3xf32, #tpu.memory_space<vmem>>, vector<1x3xf32>
    %28 = vector.broadcast %27 : vector<1x3xf32> to vector<16x3xf32>
    %29 = arith.addf %26, %28 : vector<16x3xf32>
    %c0_14 = arith.constant 0 : index
    %c0_15 = arith.constant 0 : index
    %30 = vector.load %arg6[%c0_14, %c0_15] : memref<16x3xf32, #tpu.memory_space<vmem>>, vector<16x3xf32>
    tpu.vector_store %arg6[%c0_14, %c0_15], %29 {strides = array<i32>} : memref<16x3xf32, #tpu.memory_space<vmem>>, vector<16x3xf32>,
    return
  }
  func.func @transform_0(%arg0: i32) -> (i32, i32) {
    %c0_i32 = arith.constant 0 : i32
    %c0_i32_0 = arith.constant 0 : i32
    %c0_i32_1 = arith.constant 0 : i32
    return %c0_i32, %c0_i32_0 : i32, i32
  }
  func.func @transform_1(%arg0: i32) -> (i32, i32) {
    %c0_i32 = arith.constant 0 : i32
    %c0_i32_0 = arith.constant 0 : i32
    %c0_i32_1 = arith.constant 0 : i32
    return %c0_i32, %c0_i32_0 : i32, i32
  }
  func.func @transform_2(%arg0: i32) -> (i32, i32) {
    %c0_i32 = arith.constant 0 : i32
    %c0_i32_0 = arith.constant 0 : i32
    %c0_i32_1 = arith.constant 0 : i32
    return %c0_i32, %c0_i32_0 : i32, i32
  }
  func.func @transform_3(%arg0: i32) -> (i32, i32) {
    %c0_i32 = arith.constant 0 : i32
    %c0_i32_0 = arith.constant 0 : i32
    %c0_i32_1 = arith.constant 0 : i32
    return %c0_i32, %c0_i32_0 : i32, i32
  }
  func.func @transform_4(%arg0: i32) -> (i32, i32) {
    %c0_i32 = arith.constant 0 : i32
    %c0_i32_0 = arith.constant 0 : i32
    %c0_i32_1 = arith.constant 0 : i32
    return %c0_i32, %c0_i32_0 : i32, i32
  }
  func.func @transform_5(%arg0: i32) -> (i32, i32) {
    %c0_i32 = arith.constant 0 : i32
    %c0_i32_0 = arith.constant 0 : i32
    %c0_i32_1 = arith.constant 0 : i32
    return %c0_i32, %c0_i32_0 : i32, i32
  }
}

</mosaic_0001>

<bundles_post_ra>
// kernel: transformer_forward.14
= control target key start
LH: loop header
LB: loop body
LE: loop exit
PB: predicated region body
PF: predicated region fallthrough
CT: control target
= control target key end

     0   :  { %s372_s12 = smov 0   ;;  %s398_s0 = inlined_call_operand.vmem [shape: f32[2,8,12], index: 0, kind: input, shape index: {}]   ;;  %s399_s1 = inlined_call_operand.vmem [shape: f32[12,32], index: 1, kind: input, shape index: {}]   ;;  %s400_s2 = inlined_call_operand.vmem [shape: f32[8,32], index: 2, kind: input, shape index: {}]   ;;  %s401_s3 = inlined_call_operand.vmem [shape: f32[2,8,32], index: 3, kind: output, shape index: {}]  }
   0x1 LB: > { %s303_s13 = sadd.s32 4294967295, %s346_s12   ;;  %p307_p0 = scmp.ge.s32.totalorder %s346_s12, 1  ;;  %s346_s12 = sphi %s372_s12, %s13_s12  }
   0x2   : > { %p136_p1 = scmp.lt.s32.totalorder %s346_s12, 3 }
   0x4   : > { %p137_p2 = pnand %p307_p0, %p136_p1 }
   0x5   : > { %v167_v0 = vld [vmem:[%s399_s1] sm:$0xff] (!%p137_p2)  ;;  %v168_v1 = vld [vmem:[%s399_s1 + $0x8] sm:$0xf] (!%p137_p2)  ;;  %vm174_vm0 = vcmask (!%p137_p2), 1043456   ;;  %v348_v2 = vmov (!%p137_p2), 0.0|0.0   ;;  %vm349_vm1 = vmmov (!%p137_p2), 1  }
   0x6   : > { %140 = sbr.rel (%p137_p2) target bundleno = 232 (0xe8), region = 32  ;;  %324 = vmatprep.subr.bf16.mxu0 (!%p137_p2), %v348_v2  ;;  %v325_v3 = vpack.c.bf16 (!%p137_p2), %v168_v1, %v167_v0  ;;  %vm326_vm2 = vmpackc.low (!%p137_p2), %vm174_vm0, %vm349_vm1  ;;  %p158_p3 = scmp.lt.s32.totalorder (!%p137_p2), %s303_s13, 1  ;;  %vm350_vm3 = vmmov (!%p137_p2), 0   ;;  %v351_v4 = vmov (!%p137_p2), 0.0   ;;  %vm170_vm4 = vcmask (!%p137_p2), 97280   ;;  %v169_v6 = vld [vmem:[%s400_s2] sm:$0xff] (!%p137_p2) }
   0x7   : > { %321 = vmatprep.mubr.msk.f32.mxu0 (!%p137_p2), %vm350_vm3, %v351_v4  ;;  %vm248_vm5 = vcmask (!%p137_p2), 261120  }
   0x8   : > { %327 = vmatpush3.bf16.msk.msra.mxu0 (!%p137_p2), %vm326_vm2, %v325_v3 }
   0xd   : > { %s403_s13 = smov (!%p158_p3, %s303_s13), 1 }
   0xe   : > { %s308_s18 = sshll.u32 %s403_s13, 3 }
   0xf   : > { %s161_s21 = scalar_lea.vmem %s398_s0, %s308_s18  ;;  %s165_s26 = scalar_lea.vmem %s401_s3, %s308_s18 }
  0x10   : > { %v166_v5 = vld [vmem:[%s161_s21] sm:$0xff] }
  0x11   : > { %322 = vmatmul.mubr.msk.f32.vlgmr.msra.gmra.mrb[0].mxu0 %vm170_vm4, %v166_v5 }
  0xe4   : > { %v244_v7 = vpop.f32.mrb[0].mxu0 }
  0xe5   : > { %v245_v8 = vadd.f32 %v244_v7, %v169_v6  ;;  %v323_v9 = vpop.f32.mrb[1].mxu0 }
  0xe7   : > { %249 = vst.msk [vmem:[%s165_s26] sm:$0xff] %vm248_vm5, %v245_v8 }
  0xe8 PF: > { %s13_s12 = sadd.s32 1, %s346_s12  }
  0xe9   : > { %p10_p4 = scmp.ge.s32.totalorder %s13_s12, 4  }
  0xeb   :  { %12 = sbr.rel (!%p10_p4) target bundleno = 1 (0x1), region = 62 }

// kernel: transformer_forward.20
= control target key start
LH: loop header
LB: loop body
LE: loop exit
PB: predicated region body
PF: predicated region fallthrough
CT: control target
= control target key end

     0   :  { %vm16_vm0 = vcmask 261120   ;;  %s118_s0 = inlined_call_operand.vmem [shape: f32[16,32], index: 0, kind: input, shape index: {}]   ;;  %s119_s1 = inlined_call_operand.vmem [shape: f32[1,32], index: 1, kind: input, shape index: {}]   ;;  %s120_s2 = inlined_call_operand.vmem [shape: f32[1,32], index: 2, kind: input, shape index: {}]   ;;  %s121_s3 = inlined_call_operand.vmem [shape: f32[16,32], index: 3, kind: output, shape index: {}]  }
   0x1   :  { %v14_v0 = vld [vmem:[%s118_s0] sm:$0xff]  ;;  %v15_v1 = vld [vmem:[%s118_s0 + $0x8] sm:$0xff] }
   0x2   :  { %v17_v2 = vsel %vm16_vm0, %v14_v0, 0.0  ;;  %v20_v3 = vsel %vm16_vm0, %v15_v1, 0.0  ;;  %v68_v21 = vld [vmem:[%s119_s1] ss:$0 sm:$0xff] }
   0x3   :  { %18 = vadd.xlane.f32.xlu0 %v17_v2  ;;  %v69_v23 = vld [vmem:[%s120_s2] ss:$0 sm:$0xff] }
   0x7   :  { %21 = vadd.xlane.f32.xlu0 %v20_v3 }
  0x90   :  { %v19_v4 = vpop.xlane.xlu0 %18 }
  0x91   :  { %v24_v5 = vmul.f32 0.03125, %v19_v4 }
  0x93   :  { %v26_v6 = vsub.f32 %v14_v0, %v24_v5 }
  0x94   :  { %v22_v7 = vpop.xlane.xlu0 %21 }
  0x95   :  { %v25_v8 = vmul.f32 0.03125, %v22_v7  ;;  %v28_v9 = vmul.f32 %v26_v6, %v26_v6 }
  0x97   :  { %v27_v10 = vsub.f32 %v15_v1, %v25_v8  ;;  %v30_v11 = vsel %vm16_vm0, %v28_v9, 0.0 }
  0x98   :  { %31 = vadd.xlane.f32.xlu1 %v30_v11 }
  0x99   :  { %v29_v12 = vmul.f32 %v27_v10, %v27_v10 }
  0x9b   :  { %v33_v13 = vsel %vm16_vm0, %v29_v12, 0.0 }
  0x9c   :  { %34 = vadd.xlane.f32.xlu1 %v33_v13 }
 0x125   :  { %v32_v14 = vpop.xlane.xlu1 %31 }
 0x126   :  { %v36_v15 = vmul.f32 0.03125, %v32_v14 }
 0x128   :  { %v38_v16 = vadd.f32 1e-05, %v36_v15 }
 0x129   :  { %v35_v17 = vpop.xlane.xlu1 %34 }
 0x12a   :  { %70 = vrsqrt.f32 %v38_v16  ;;  %v37_v18 = vmul.f32 0.03125, %v35_v17 }
 0x12c   :  { %v39_v19 = vadd.f32 1e-05, %v37_v18 }
 0x12e   :  { %72 = vrsqrt.f32 %v39_v19 }
 0x134   :  { %v71_v20 = vpop.eup %70 }
 0x135   :  { %v42_v22 = vmul.f32 %v71_v20, %v26_v6 }
 0x137   :  { %v51_v24 = vmul.f32 %v68_v21, %v42_v22 }
 0x138   :  { %v73_v25 = vpop.eup %72 }
 0x139   :  { %v60_v26 = vadd.f32 %v69_v23, %v51_v24  ;;  %v43_v27 = vmul.f32 %v73_v25, %v27_v10 }
 0x13b   :  { %62 = vst.msk [vmem:[%s121_s3] sm:$0xff] %vm16_vm0, %v60_v26  ;;  %v52_v28 = vmul.f32 %v68_v21, %v43_v27 }
 0x13d   :  { %v61_v29 = vadd.f32 %v69_v23, %v52_v28 }
 0x13f   :  { %63 = vst.msk [vmem:[%s121_s3 + $0x8] sm:$0xff] %vm16_vm0, %v61_v29 }

// kernel: transformer_forward.17
= control target key start
LH: loop header
LB: loop body
LE: loop exit
PB: predicated region body
PF: predicated region fallthrough
CT: control target
= control target key end

     0   :  { %s676_s24 = smov 0   ;;  %s752_s0 = inlined_call_operand.vmem [shape: f32[2,8,32], index: 0, kind: input, shape index: {}]   ;;  %s753_s1 = inlined_call_operand.vmem [shape: f32[32,64], index: 1, kind: input, shape index: {}]   ;;  %s754_s2 = inlined_call_operand.vmem [shape: f32[1,64], index: 2, kind: input, shape index: {}]   ;;  %s755_s3 = inlined_call_operand.vmem [shape: f32[64,32], index: 3, kind: input, shape index: {}]   ;;  %s756_s4 = inlined_call_operand.vmem [shape: f32[1,32], index: 4, kind: input, shape index: {}]   ;;  %s757_s5 = inlined_call_operand.vmem [shape: f32[1,32], index: 5, kind: input, shape index: {}]   ;;  %s758_s6 = inlined_call_operand.vmem [shape: f32[1,32], index: 6, kind: input, shape index: {}]   ;;  %s759_s7 = inlined_call_operand.vmem [shape: f32[2,8,32], index: 7, kind: output, shape index: {}]  }
   0x1 LB: > { %s535_s25 = sadd.s32 4294967295, %s631_s24   ;;  %p539_p0 = scmp.ge.s32.totalorder %s631_s24, 1  ;;  %s631_s24 = sphi %s676_s24, %s17_s24  }
   0x2   : > { %p236_p1 = scmp.lt.s32.totalorder %s631_s24, 3 }
   0x4   : > { %p237_p2 = pnand %p539_p0, %p236_p1 }
   0x5   : > { %v275_v0 = vld [vmem:[%s753_s1] sm:$0xff] (!%p237_p2)  ;;  %v276_v1 = vld [vmem:[%s753_s1 + $0x8] sm:$0xff] (!%p237_p2)  ;;  %v277_v2 = vld [vmem:[%s753_s1 + $0x10] sm:$0xff] (!%p237_p2)  ;;  %v633_v3 = vmov (!%p237_p2), 0.0|0.0   ;;  %vm634_vm0 = vmmov (!%p237_p2), 0   ;;  %v635_v6 = vmov (!%p237_p2), 0.0  }
   0x6   : > { %240 = sbr.rel (%p237_p2) target bundleno = 763 (0x2fb), region = 48  ;;  %594 = vmatprep.subr.bf16.mxu0 (!%p237_p2), %v633_v3  ;;  %v595_v4 = vpack.c.bf16 (!%p237_p2), %v276_v1, %v275_v0  ;;  %v278_v5 = vld [vmem:[%s753_s1 + $0x18] sm:$0xff] (!%p237_p2)  ;;  %572 = vmatprep.mubr.msk.f32.mxu0 (!%p237_p2), %vm634_vm0, %v635_v6  ;;  %p266_p3 = scmp.lt.s32.totalorder (!%p237_p2), %s535_s25, 1  ;;  %v361_v7 = vld [vmem:[%s755_s3] sm:$0xff] (!%p237_p2)  ;;  %v362_v8 = vld [vmem:[%s755_s3 + $0x8] sm:$0xff] (!%p237_p2)  ;;  %vm286_vm1 = vcmask (!%p237_p2), 261120  }
   0x7   : > { %600 = vmatprep.subr.bf16.mxu1 (!%p237_p2), %v633_v3  ;;  %v601_v9 = vpack.c.bf16 (!%p237_p2), %v362_v8, %v361_v7  ;;  %v363_v10 = vld [vmem:[%s755_s3 + $0x10] sm:$0xff] (!%p237_p2)  ;;  %v364_v11 = vld [vmem:[%s755_s3 + $0x18] sm:$0xff] (!%p237_p2)  ;;  %591 = vmatprep.mubr.msk.f32.mxu1 (!%p237_p2), %vm634_vm0, %v635_v6  ;;  %v598_v12 = vpack.c.bf16 (!%p237_p2), %v278_v5, %v277_v2  ;;  %v365_v14 = vld [vmem:[%s755_s3 + $0x20] sm:$0xff] (!%p237_p2)  ;;  %vm376_vm2 = vcmask (!%p237_p2), 523264  }
   0x8   : > { %596 = vmatpush3.bf16.msra.mxu0 (!%p237_p2), %v595_v4  ;;  %v604_v13 = vpack.c.bf16 (!%p237_p2), %v364_v11, %v363_v10  ;;  %v366_v15 = vld [vmem:[%s755_s3 + $0x28] sm:$0xff] (!%p237_p2)  ;;  %v367_v18 = vld [vmem:[%s755_s3 + $0x30] sm:$0xff] (!%p237_p2)  ;;  %v368_v19 = vld [vmem:[%s755_s3 + $0x38] sm:$0xff] (!%p237_p2) }
   0x9   : > { %597 = vmatprep.subr.bf16.mxu0 (!%p237_p2), %v633_v3  ;;  %602 = vmatpush3.bf16.msra.mxu1 (!%p237_p2), %v601_v9  ;;  %v607_v17 = vpack.c.bf16 (!%p237_p2), %v366_v15, %v365_v14  ;;  %v610_v20 = vpack.c.bf16 (!%p237_p2), %v368_v19, %v367_v18  ;;  %v542_v21 = vld [vmem:[%s754_s2] ss:$0 sm:$0xff] (!%p237_p2) }
   0xa   : > { %603 = vmatprep.subr.bf16.mxu1 (!%p237_p2), %v633_v3  ;;  %v544_v26 = vld [vmem:[%s756_s4] ss:$0 sm:$0xff] (!%p237_p2) }
   0xb   : > { %v546_v41 = vld [vmem:[%s757_s5] ss:$0 sm:$0xff] (!%p237_p2) }
   0xc   : > { %599 = vmatpush3.bf16.msra.mxu0 (!%p237_p2), %v598_v12  ;;  %v547_v43 = vld [vmem:[%s758_s6] ss:$0 sm:$0xff] (!%p237_p2) }
   0xd   : > { %s761_s25 = smov (!%p266_p3, %s535_s25), 1  ;;  %605 = vmatpush3.bf16.msra.mxu1 %v604_v13 }
   0xe   : > { %s540_s19 = sshll.u32 %s761_s25, 3  ;;  %606 = vmatprep.subr.bf16.mxu1 %v633_v3 }
   0xf   : > { %s269_s28 = scalar_lea.vmem %s752_s0, %s540_s19  ;;  %s273_s21 = scalar_lea.vmem %s759_s7, %s540_s19 }
  0x10   : > { %v274_v16 = vld [vmem:[%s269_s28] sm:$0xff] }
  0x11   : > { %573 = vmatmul.mubr.msk.f32.vlgmr.msra.gmra.mrb[0].mxu0 %vm286_vm1, %v274_v16  ;;  %608 = vmatpush3.bf16.msra.mxu1 %v607_v17 }
  0x12   : > { %609 = vmatprep.subr.bf16.mxu1 %v633_v3 }
  0x15   : > { %611 = vmatpush3.bf16.msra.mxu1 %v610_v20 }
  0xe4   : > { %v356_v22 = vpop.f32.mrb[0].mxu0 }
  0xe5   : > { %v357_v23 = vadd.f32 %v542_v21, %v356_v22  ;;  %v574_v24 = vpop.f32.mrb[1].mxu0 }
  0xe7   : > { %v360_v25 = vmax.f32 %v357_v23, 0.0 }
  0xe9   : > { %592 = vmatmul.mubr.msk.f32.vlgmr.msra.gmra.mrb[0].mxu1 %vm376_vm2, %v360_v25 }
 0x1bc   : > { %v446_v27 = vpop.f32.mrb[0].mxu1 }
 0x1bd   : > { %v447_v28 = vadd.f32 %v544_v26, %v446_v27  ;;  %v593_v29 = vpop.f32.mrb[1].mxu1 }
 0x1bf   : > { %v450_v30 = vadd.f32 %v447_v28, %v274_v16 }
 0x1c1   : > { %v451_v31 = vsel %vm286_vm1, %v450_v30, 0.0 }
 0x1c2   : > { %452 = vadd.xlane.f32.xlu0 %v451_v31 }
 0x24f   : > { %v453_v32 = vpop.xlane.xlu0 %452 }
 0x250   : > { %v455_v33 = vmul.f32 0.03125, %v453_v32 }
 0x252   : > { %v456_v34 = vsub.f32 %v450_v30, %v455_v33 }
 0x254   : > { %v457_v35 = vmul.f32 %v456_v34, %v456_v34 }
 0x256   : > { %v458_v36 = vsel %vm286_vm1, %v457_v35, 0.0 }
 0x257   : > { %459 = vadd.xlane.f32.xlu0 %v458_v36 }
 0x2e4   : > { %v460_v37 = vpop.xlane.xlu0 %459 }
 0x2e5   : > { %v461_v38 = vmul.f32 0.03125, %v460_v37 }
 0x2e7   : > { %v462_v39 = vadd.f32 1e-05, %v461_v38 }
 0x2e9   : > { %623 = vrsqrt.f32 %v462_v39 }
 0x2f3   : > { %v624_v40 = vpop.eup %623 }
 0x2f4   : > { %v464_v42 = vmul.f32 %v624_v40, %v456_v34 }
 0x2f6   : > { %v472_v44 = vmul.f32 %v546_v41, %v464_v42 }
 0x2f8   : > { %v480_v45 = vadd.f32 %v547_v43, %v472_v44 }
 0x2fa   : > { %481 = vst.msk [vmem:[%s273_s21] sm:$0xff] %vm286_vm1, %v480_v45 }
 0x2fb PF: > { %s17_s24 = sadd.s32 1, %s631_s24  }
 0x2fc   : > { %p14_p4 = scmp.ge.s32.totalorder %s17_s24, 4  }
 0x2fe   :  { %16 = sbr.rel (!%p14_p4) target bundleno = 1 (0x1), region = 78 }

// kernel: transformer_forward.27
= control target key start
LH: loop header
LB: loop body
LE: loop exit
PB: predicated region body
PF: predicated region fallthrough
CT: control target
= control target key end

     0   :  { %vm22_vm0 = vcmask 261120   ;;  %vm160_vm1 = vcmask 23552   ;;  %s270_s0 = inlined_call_operand.vmem [shape: f32[16,32], index: 0, kind: input, shape index: {}]   ;;  %s271_s3 = inlined_call_operand.vmem [shape: f32[32,3], index: 3, kind: input, shape index: {}]   ;;  %s272_s1 = inlined_call_operand.vmem [shape: f32[1,32], index: 1, kind: input, shape index: {}]   ;;  %s273_s2 = inlined_call_operand.vmem [shape: f32[1,32], index: 2, kind: input, shape index: {}]   ;;  %s274_s4 = inlined_call_operand.vmem [shape: f32[1,3], index: 4, kind: input, shape index: {}]   ;;  %s275_s5 = inlined_call_operand.vmem [shape: f32[16,3], index: 5, kind: output, shape index: {}]  }
   0x1   :  { %v20_v0 = vld [vmem:[%s270_s0] sm:$0xff]  ;;  %v21_v1 = vld [vmem:[%s270_s0 + $0x8] sm:$0xff]  ;;  %v70_v16 = vld [vmem:[%s271_s3 + $0x10] sm:$0xff] }
   0x2   :  { %v23_v2 = vsel %vm22_vm0, %v20_v0, 0.0  ;;  %v26_v3 = vsel %vm22_vm0, %v21_v1, 0.0  ;;  %v68_v14 = vld [vmem:[%s271_s3] sm:$0xff]  ;;  %v69_v15 = vld [vmem:[%s271_s3 + $0x8] sm:$0xff]  ;;  %v71_v18 = vld [vmem:[%s271_s3 + $0x18] sm:$0xff] }
   0x3   :  { %24 = vadd.xlane.f32.xlu0 %v23_v2  ;;  %v189_v17 = vpack.c.bf16 %v69_v15, %v68_v14  ;;  %v193_v19 = vpack.c.bf16 %v71_v18, %v70_v16  ;;  %v167_v27 = vld [vmem:[%s272_s1] ss:$0 sm:$0xff] }
   0x4   :  { %v168_v29 = vld [vmem:[%s273_s2] ss:$0 sm:$0xff] }
   0x5   :  { %190 = vmatprep.subr.bf16.mxu0 %v189_v17  ;;  %v169_v36 = vld [vmem:[%s274_s4] ss:$0 sm:$0xff] }
   0x6   :  { %192 = vmatpush3.bf16.msra.mxu0 %v189_v17 }
   0x7   :  { %27 = vadd.xlane.f32.xlu0 %v26_v3  ;;  %194 = vmatprep.subr.bf16.mxu0 %v193_v19 }
   0xa   :  { %196 = vmatpush3.bf16.msra.mxu0 %v193_v19 }
  0x90   :  { %v25_v4 = vpop.xlane.xlu0 %24 }
  0x91   :  { %v30_v5 = vmul.f32 0.03125, %v25_v4 }
  0x93   :  { %v32_v6 = vsub.f32 %v20_v0, %v30_v5 }
  0x94   :  { %v28_v7 = vpop.xlane.xlu0 %27 }
  0x95   :  { %v31_v8 = vmul.f32 0.03125, %v28_v7  ;;  %v34_v9 = vmul.f32 %v32_v6, %v32_v6 }
  0x97   :  { %v33_v10 = vsub.f32 %v21_v1, %v31_v8  ;;  %v36_v11 = vsel %vm22_vm0, %v34_v9, 0.0 }
  0x98   :  { %37 = vadd.xlane.f32.xlu1 %v36_v11 }
  0x99   :  { %v35_v12 = vmul.f32 %v33_v10, %v33_v10 }
  0x9b   :  { %v39_v13 = vsel %vm22_vm0, %v35_v12, 0.0 }
  0x9c   :  { %40 = vadd.xlane.f32.xlu1 %v39_v13 }
 0x125   :  { %v38_v20 = vpop.xlane.xlu1 %37 }
 0x126   :  { %v42_v21 = vmul.f32 0.03125, %v38_v20 }
 0x128   :  { %v44_v22 = vadd.f32 1e-05, %v42_v21 }
 0x129   :  { %v41_v23 = vpop.xlane.xlu1 %40 }
 0x12a   :  { %197 = vrsqrt.f32 %v44_v22  ;;  %v43_v24 = vmul.f32 0.03125, %v41_v23 }
 0x12c   :  { %v45_v25 = vadd.f32 1e-05, %v43_v24 }
 0x12e   :  { %199 = vrsqrt.f32 %v45_v25 }
 0x134   :  { %v198_v26 = vpop.eup %197 }
 0x135   :  { %v48_v28 = vmul.f32 %v198_v26, %v32_v6 }
 0x137   :  { %v57_v30 = vmul.f32 %v167_v27, %v48_v28 }
 0x138   :  { %v200_v31 = vpop.eup %199 }
 0x139   :  { %v49_v32 = vmul.f32 %v200_v31, %v33_v10  ;;  %v66_v33 = vadd.f32 %v168_v29, %v57_v30 }
 0x13b   :  { %v58_v34 = vmul.f32 %v167_v27, %v49_v32  ;;  %186 = vmatprep.mubr.msk.f32.mxu0 %vm22_vm0, %v66_v33 }
 0x13d   :  { %v67_v35 = vadd.f32 %v168_v29, %v58_v34 }
 0x13f   :  { %187 = vmatmul.mubr.msk.f32.vlgmr.msra.gmra.mrb[0].mxu0 %vm22_vm0, %v67_v35 }
 0x212   :  { %v188_v37 = vpop.f32.mrb[0].mxu0 }
 0x213   :  { %v157_v38 = vadd.f32 %v188_v37, %v169_v36  ;;  %v151_v39 = vpop.f32.mrb[1].mxu0 }
 0x214   :  { %v152_v40 = vadd.f32 %v169_v36, %v151_v39 }
 0x215   :  { %162 = vst.msk [vmem:[%s275_s5 + $0x8] sm:$0xff] %vm160_vm1, %v157_v38 }
 0x216   :  { %161 = vst.msk [vmem:[%s275_s5] sm:$0xff] %vm160_vm1, %v152_v40 }

// kernel: transformer_forward.16
= control target key start
LH: loop header
LB: loop body
LE: loop exit
PB: predicated region body
PF: predicated region fallthrough
CT: control target
= control target key end

     0   :  { %s3030_s21 = smov 0   ;;  %s3399_s0 = inlined_call_operand.vmem [shape: f32[2,8,32], index: 0, kind: input, shape index: {}, may-alias: {0,1}]   ;;  %s3400_s1 = inlined_call_operand.vmem [shape: f32[2,8,32], index: 1, kind: input, shape index: {}, may-alias: {0,1}]   ;;  %s3401_s2 = inlined_call_operand.vmem [shape: f32[4,32,8], index: 2, kind: input, shape index: {}]   ;;  %s3402_s3 = inlined_call_operand.vmem [shape: f32[4,1,8], index: 3, kind: input, shape index: {}]   ;;  %s3403_s4 = inlined_call_operand.vmem [shape: f32[4,32,8], index: 4, kind: input, shape index: {}]   ;;  %s3404_s5 = inlined_call_operand.vmem [shape: f32[4,1,8], index: 5, kind: input, shape index: {}]   ;;  %s3405_s6 = inlined_call_operand.vmem [shape: f32[4,32,8], index: 6, kind: input, shape index: {}]   ;;  %s3406_s7 = inlined_call_operand.vmem [shape: f32[4,1,8], index: 7, kind: input, shape index: {}]   ;;  %s3407_s8 = inlined_call_operand.vmem [shape: f32[4,8,32], index: 8, kind: input, shape index: {}]   ;;  %s3408_s9 = inlined_call_operand.vmem [shape: f32[1,32], index: 9, kind: input, shape index: {}]   ;;  %s3409_s10 = inlined_call_operand.vmem [shape: f32[1,32], index: 10, kind: input, shape index: {}]   ;;  %s3410_s11 = inlined_call_operand.vmem [shape: f32[1,32], index: 11, kind: input, shape index: {}]   ;;  %s3411_s12 = inlined_call_operand.vmem [shape: f32[2,8,32], index: 12, kind: output, shape index: {}]  }
   0x1 LB: > { %s2476_s22 = sadd.s32 4294967295, %s2960_s21   ;;  %p2480_p0 = scmp.ge.s32.totalorder %s2960_s21, 1  ;;  %s2960_s21 = sphi %s3030_s21, %s22_s21  }
   0x2   : > { %p370_p1 = scmp.lt.s32.totalorder %s2960_s21, 3 }
   0x4   : > { %p371_p2 = pnand %p2480_p0, %p370_p1 }
   0x5   : > { %v428_v0 = vld [vmem:[%s3401_s2] sm:$0xff] (!%p371_p2)  ;;  %v429_v1 = vld [vmem:[%s3401_s2 + $0x8] sm:$0xff] (!%p371_p2)  ;;  %v2962_v3 = vmov (!%p371_p2), 0.0|0.0   ;;  %v430_v6 = vld [vmem:[%s3401_s2 + $0x10] sm:$0xff] (!%p371_p2)  ;;  %p414_p3 = scmp.lt.s32.totalorder (!%p371_p2), %s2476_s22, 1  ;;  %vm2963_vm0 = vmmov (!%p371_p2), 0  }
   0x6   : > { %374 = sbr.rel (%p371_p2) target bundleno = 4181 (0x1055), region = 68  ;;  %v514_v2 = vld [vmem:[%s3403_s4] sm:$0xff] (!%p371_p2)  ;;  %2853 = vmatprep.subr.bf16.mxu0 (!%p371_p2), %v2962_v3  ;;  %2859 = vmatprep.subr.bf16.mxu1 (!%p371_p2), %v2962_v3  ;;  %v2854_v4 = vpack.c.bf16 (!%p371_p2), %v429_v1, %v428_v0  ;;  %v515_v5 = vld [vmem:[%s3403_s4 + $0x8] sm:$0xff] (!%p371_p2)  ;;  %v431_v7 = vld [vmem:[%s3401_s2 + $0x18] sm:$0xff] (!%p371_p2)  ;;  %v2964_v11 = vmov (!%p371_p2), 0.0   ;;  %vm439_vm1 = vcmask (!%p371_p2), 261120  }
   0x7   : > { %v2860_v8 = vpack.c.bf16 (!%p371_p2), %v515_v5, %v514_v2  ;;  %v516_v9 = vld [vmem:[%s3403_s4 + $0x10] sm:$0xff] (!%p371_p2)  ;;  %v517_v10 = vld [vmem:[%s3403_s4 + $0x18] sm:$0xff] (!%p371_p2)  ;;  %2669 = vmatprep.mubr.msk.f32.mxu0 (!%p371_p2), %vm2963_vm0, %v2964_v11  ;;  %2680 = vmatprep.mubr.msk.f32.mxu1 (!%p371_p2), %vm2963_vm0, %v2964_v11  ;;  %v2857_v12 = vpack.c.bf16 (!%p371_p2), %v431_v7, %v430_v6  ;;  %v2484_v16 = vld [vmem:[%s3402_s3] ss:$0 sm:$0xff] (!%p371_p2)  ;;  %vm679_vm2 = vcmask (!%p371_p2), 64512  }
   0x8   : > { %2855 = vmatpush3.bf16.msra.mxu0 (!%p371_p2), %v2854_v4  ;;  %v2863_v13 = vpack.c.bf16 (!%p371_p2), %v517_v10, %v516_v9  ;;  %v2486_v17 = vld [vmem:[%s3404_s5] ss:$0 sm:$0xff] (!%p371_p2)  ;;  %v599_v26 = vld [vmem:[%s3405_s6 + $0x8] sm:$0xff] (!%p371_p2)  ;;  %v600_v27 = vld [vmem:[%s3405_s6 + $0x10] sm:$0xff] (!%p371_p2) }
   0x9   : > { %2861 = vmatpush3.bf16.msra.mxu1 (!%p371_p2), %v2860_v8  ;;  %2856 = vmatprep.subr.bf16.mxu0 (!%p371_p2), %v2962_v3  ;;  %v598_v25 = vld [vmem:[%s3405_s6] sm:$0xff] (!%p371_p2)  ;;  %v601_v29 = vld [vmem:[%s3405_s6 + $0x18] sm:$0xff] (!%p371_p2)  ;;  %v2494_v44 = vld [vmem:[%s3401_s2 + $0x28] sm:$0xff] (!%p371_p2) }
   0xa   : > { %2862 = vmatprep.subr.bf16.mxu1 (!%p371_p2), %v2962_v3  ;;  %v2866_v28 = vpack.c.bf16 (!%p371_p2), %v599_v26, %v598_v25  ;;  %v2869_v30 = vpack.c.bf16 (!%p371_p2), %v601_v29, %v600_v27  ;;  %v2488_v40 = vld [vmem:[%s3406_s7] ss:$0 sm:$0xff] (!%p371_p2)  ;;  %v2495_v46 = vld [vmem:[%s3401_s2 + $0x30] sm:$0xff] (!%p371_p2)  ;;  %v2496_v47 = vld [vmem:[%s3401_s2 + $0x38] sm:$0xff] (!%p371_p2) }
   0xb   : > { %v2493_v43 = vld [vmem:[%s3401_s2 + $0x20] sm:$0xff] (!%p371_p2)  ;;  %v2875_v48 = vpack.c.bf16 (!%p371_p2), %v2496_v47, %v2495_v46  ;;  %v2501_v51 = vld [vmem:[%s3403_s4 + $0x28] sm:$0xff] (!%p371_p2)  ;;  %v2502_v55 = vld [vmem:[%s3403_s4 + $0x30] sm:$0xff] (!%p371_p2) }
   0xc   : > { %2858 = vmatpush3.bf16.msra.mxu0 (!%p371_p2), %v2857_v12  ;;  %v2872_v45 = vpack.c.bf16 (!%p371_p2), %v2494_v44, %v2493_v43  ;;  %v2500_v50 = vld [vmem:[%s3403_s4 + $0x20] sm:$0xff] (!%p371_p2)  ;;  %v2503_v56 = vld [vmem:[%s3403_s4 + $0x38] sm:$0xff] (!%p371_p2)  ;;  %v2508_v7 = vld [vmem:[%s3405_s6 + $0x28] sm:$0xff] (!%p371_p2) }
   0xd   : > { %s3413_s22 = smov (!%p414_p3, %s2476_s22), 1  ;;  %2864 = vmatpush3.bf16.msra.mxu1 %v2863_v13  ;;  %2865 = vmatprep.subr.bf16.mxu0 %v2962_v3  ;;  %v2878_v53 = vpack.c.bf16 %v2501_v51, %v2500_v50  ;;  %v2881_v57 = vpack.c.bf16 %v2503_v56, %v2502_v55  ;;  %v2498_v62 = vld [vmem:[%s3402_s3 + $0x1] ss:$0 sm:$0xff]  ;;  %v2509_v8 = vld [vmem:[%s3405_s6 + $0x30] sm:$0xff]  ;;  %v2510_v10 = vld [vmem:[%s3405_s6 + $0x38] sm:$0xff] }
   0xe   : > { %s3070_s23 = sshll.u32 %s3413_s22, 3  ;;  %2694 = vmatprep.subr.mxu1 %v2964_v11  ;;  %v2505_v0 = vld [vmem:[%s3404_s5 + $0x1] ss:$0 sm:$0xff]  ;;  %v2887_v12 = vpack.c.bf16 %v2510_v10, %v2509_v8  ;;  %v2517_v27 = vld [vmem:[%s3407_s8 + $0x8] sm:$0xff]  ;;  %v2525_v55 = vld [vmem:[%s3402_s3 + $0x2] ss:$0 sm:$0xff] }
   0xf   : > { %s417_s26 = scalar_lea.vmem %s3399_s0, %s3070_s23  ;;  %s421_s29 = scalar_lea.vmem %s3400_s1, %s3070_s23  ;;  %v2507_v6 = vld [vmem:[%s3405_s6 + $0x20] sm:$0xff] }
  0x10   : > { %v3080_v14 = vld [vmem:[%s417_s26] sm:$0xff]  ;;  %v2884_v9 = vpack.c.bf16 %v2508_v7, %v2507_v6  ;;  %s425_s19 = scalar_lea.vmem %s3411_s12, %s3070_s23 }
  0x11   : > { %v3082_v15 = vld [vmem:[%s421_s29] sm:$0xff]  ;;  %2670 = vmatmul.mubr.msk.f32.vlgmr.msra.gmra.mrb[0].mxu0 %vm439_vm1, %v3080_v14 }
  0x12   : > { %2681 = vmatmul.mubr.msk.f32.vlgmr.msra.gmra.mrb[0].mxu1 %vm439_vm1, %v3082_v15  ;;  %2691 = vmatprep.mubr.msk.f32.mxu0 %vm2963_vm0, %v2964_v11 }
  0x13   : > { %2696 = vmatprep.mubr.msk.f32.mxu1 %vm2963_vm0, %v2964_v11  ;;  %2867 = vmatpush3.bf16.msra.mxu0 %v2866_v28 }
  0x14   : > { %2868 = vmatprep.subr.bf16.mxu0 %v2962_v3 }
  0x17   : > { %2870 = vmatpush3.bf16.msra.mxu0 %v2869_v30 }
  0x18   : > { %2871 = vmatprep.subr.bf16.mxu0 %v2962_v3 }
  0x1a   : > { %2692 = vmatmul.mubr.msk.f32.vlgmr.msra.gmra.mrb[2].mxu0 %vm439_vm1, %v3082_v15 }
  0x1b   : > { %2712 = vmatprep.mubr.msk.f32.mxu0 %vm2963_vm0, %v2964_v11  ;;  %2873 = vmatpush3.bf16.msra.mxu0 %v2872_v45 }
  0x1c   : > { %2874 = vmatprep.subr.bf16.mxu0 %v2962_v3 }
  0x1f   : > { %2876 = vmatpush3.bf16.msra.mxu0 %v2875_v48  ;;  %v2532_v48 = vld [vmem:[%s3404_s5 + $0x2] ss:$0 sm:$0xff] }
  0x20   : > { %2883 = vmatprep.subr.bf16.mxu0 %v2962_v3 }
  0x22   : > { %2713 = vmatmul.mubr.msk.f32.vlgmr.msra.gmra.mrb[4].mxu0 %vm439_vm1, %v3080_v14 }
  0x23   : > { %2734 = vmatprep.mubr.msk.f32.mxu0 %vm2963_vm0, %v2964_v11  ;;  %2885 = vmatpush3.bf16.msra.mxu0 %v2884_v9 }
  0x24   : > { %2886 = vmatprep.subr.bf16.mxu0 %v2962_v3 }
  0x27   : > { %2888 = vmatpush3.bf16.msra.mxu0 %v2887_v12 }
  0x28   : > { %2747 = vmatprep.subr.mxu0 %v2964_v11 }
  0x2a   : > { %2735 = vmatmul.mubr.msk.f32.vlgmr.msra.gmra.mrb[6].mxu0 %vm439_vm1, %v3082_v15 }
  0x2b   : > { %2749 = vmatprep.mubr.msk.f32.mxu0 %vm2963_vm0, %v2964_v11  ;;  %2748 = vmatpush3.msra.mxu0 %v2517_v27 }
  0x2c   : > { %2889 = vmatprep.subr.bf16.mxu0 %v2962_v3 }
  0xe4   : > { %v509_v18 = vpop.f32.mrb[0].mxu0 }
  0xe5   : > { %v510_v19 = vadd.f32 %v2484_v16, %v509_v18  ;;  %v594_v20 = vpop.f32.mrb[0].mxu1  ;;  %v2671_v21 = vpop.f32.mrb[1].mxu0 }
  0xe6   : > { %v595_v22 = vadd.f32 %v2486_v17, %v594_v20  ;;  %v2682_v23 = vpop.f32.mrb[1].mxu1 }
  0xe7   : > { %v513_v24 = vmul.f32 0.35355338, %v510_v19 }
  0xe8   : > { %2695 = vmatpush3.xpose.msk.msra.mxu1 %vm679_vm2, %v595_v22 }
  0xe9   : > { %2699 = vmatprep.subr.mxu1 %v2964_v11 }
  0xeb   : > { %2697 = vmatmul.mubr.msk.f32.vlgmr.msra.gmra.mrb[2].mxu1 %vm679_vm2, %v513_v24  ;;  %v2512_v24 = vld [vmem:[%s3406_s7 + $0x1] ss:$0 sm:$0xff] }
  0xec   : > { %2701 = vmatprep.mubr.msk.f32.mxu1 %vm2963_vm0, %v2964_v11 }
  0xed   : > { %v675_v39 = vpop.f32.mrb[2].mxu0 }
  0xee   : > { %v2693_v41 = vpop.f32.mrb[3].mxu0  ;;  %v676_v42 = vadd.f32 %v2488_v40, %v675_v39  ;;  %v2521_v39 = vld [vmem:[%s3401_s2 + $0x48] sm:$0xff] }
  0xef   : > { %v2522_v41 = vld [vmem:[%s3401_s2 + $0x50] sm:$0xff] }
  0xf0   : > { %2700 = vmatpush3.msra.mxu1 %v676_v42  ;;  %v2523_v42 = vld [vmem:[%s3401_s2 + $0x58] sm:$0xff] }
  0xf1   : > { %2877 = vmatprep.subr.bf16.mxu1 %v2962_v3  ;;  %v2893_v45 = vpack.c.bf16 %v2523_v42, %v2522_v41  ;;  %v2551_v41 = vld [vmem:[%s3402_s3 + $0x3] ss:$0 sm:$0xff] }
  0xf2   : > { %v2558_v42 = vld [vmem:[%s3404_s5 + $0x3] ss:$0 sm:$0xff] }
  0xf5   : > { %v920_v58 = vpop.f32.mrb[4].mxu0 }
  0xf6   : > { %v2714_v59 = vpop.f32.mrb[5].mxu0  ;;  %v921_v63 = vadd.f32 %v2498_v62, %v920_v58  ;;  %v2536_v62 = vld [vmem:[%s3405_s6 + $0x50] sm:$0xff] }
  0xf8   : > { %v924_v5 = vmul.f32 0.35355338, %v921_v63 }
  0xfd   : > { %v1087_v23 = vpop.f32.mrb[6].mxu0 }
  0xfe   : > { %v2736_v25 = vpop.f32.mrb[7].mxu0  ;;  %v1088_v26 = vadd.f32 %v2512_v24, %v1087_v23  ;;  %v2547_v23 = vld [vmem:[%s3401_s2 + $0x68] sm:$0xff] }
  0xff   : > { %v2548_v25 = vld [vmem:[%s3401_s2 + $0x70] sm:$0xff] }
 0x1be   : > { %v752_v31 = vpop.f32.mrb[2].mxu1 }
 0x1bf   : > { %v2698_v32 = vpop.f32.mrb[3].mxu1  ;;  %v756_v33 = vsel %vm679_vm2, %v752_v31, -inf }
 0x1c0   : > { %757 = vmax.xlane.f32.xlu0 %v756_v33  ;;  %v2527_v32 = vld [vmem:[%s3403_s4 + $0x40] sm:$0xff]  ;;  %v2528_v33 = vld [vmem:[%s3403_s4 + $0x48] sm:$0xff] }
 0x24d   : > { %v758_v34 = vpop.xlane.xlu0 %757 }
 0x24e   : > { %v759_v35 = vsub.f32 %v752_v31, %v758_v34  ;;  %v840_v31 = vld [vmem:[%s3407_s8] sm:$0xff]  ;;  %v2896_v34 = vpack.c.bf16 %v2528_v33, %v2527_v32  ;;  %v2556_v32 = vld [vmem:[%s3403_s4 + $0x78] sm:$0xff] }
 0x250   : > { %v760_v36 = vmul.f32 1.442695, %v759_v35  ;;  %v2529_v35 = vld [vmem:[%s3403_s4 + $0x50] sm:$0xff] }
 0x252   : > { %2936 = vpow2.f32 %v760_v36  ;;  %v2530_v36 = vld [vmem:[%s3403_s4 + $0x58] sm:$0xff] }
 0x25c   : > { %v2937_v37 = vpop.eup %2936 }
 0x25d   : > { %v762_v38 = vsel %vm679_vm2, %v2937_v37, 0.0 }
 0x25e   : > { %763 = vadd.xlane.f32.xlu0 %v762_v38  ;;  %v2520_v38 = vld [vmem:[%s3401_s2 + $0x40] sm:$0xff] }
 0x25f   : > { %v2890_v40 = vpack.c.bf16 %v2521_v39, %v2520_v38 }
 0x2eb   : > { %v764_v49 = vpop.xlane.xlu0 %763 }
 0x2ec   : > { %2938 = vrcp.f32 %v764_v49 }
 0x2f6   : > { %v2939_v52 = vpop.eup %2938 }
 0x2f7   : > { %v766_v54 = vmul.f32 %v2939_v52, %v2937_v37  ;;  %v2899_v37 = vpack.c.bf16 %v2530_v36, %v2529_v35 }
 0x2f9   : > { %2702 = vmatmul.mubr.msk.f32.vlgmr.msra.gmra.mrb[4].mxu1 %vm679_vm2, %v766_v54 }
 0x2fa   : > { %2879 = vmatpush3.bf16.msra.mxu1 %v2878_v53  ;;  %2723 = vmatprep.mubr.msk.f32.mxu1 %vm2963_vm0, %v2964_v11 }
 0x2fb   : > { %2880 = vmatprep.subr.bf16.mxu1 %v2962_v3 }
 0x2fe   : > { %2882 = vmatpush3.bf16.msra.mxu1 %v2881_v57 }
 0x2ff   : > { %2737 = vmatprep.subr.mxu1 %v2964_v11 }
 0x301   : > { %2724 = vmatmul.mubr.msk.f32.vlgmr.msra.gmra.mrb[6].mxu1 %vm439_vm1, %v3082_v15 }
 0x302   : > { %2739 = vmatprep.mubr.msk.f32.mxu1 %vm2963_vm0, %v2964_v11 }
 0x3cc   : > { %v836_v60 = vpop.f32.mrb[4].mxu1 }
 0x3cd   : > { %v2703_v61 = vpop.f32.mrb[5].mxu1 }
 0x3ce   : > { %v2535_v61 = vld [vmem:[%s3405_s6 + $0x48] sm:$0xff] }
 0x3d4   : > { %v1004_v1 = vpop.f32.mrb[6].mxu1 }
 0x3d5   : > { %v1005_v2 = vadd.f32 %v2505_v0, %v1004_v1  ;;  %v2725_v4 = vpop.f32.mrb[7].mxu1  ;;  %v2537_v0 = vld [vmem:[%s3405_s6 + $0x58] sm:$0xff] }
 0x3d6   : > { %v2905_v1 = vpack.c.bf16 %v2537_v0, %v2536_v62 }
 0x3d7   : > { %2738 = vmatpush3.xpose.msk.msra.mxu1 %vm679_vm2, %v1005_v2 }
 0x3d8   : > { %2742 = vmatprep.subr.mxu1 %v2964_v11 }
 0x3da   : > { %2740 = vmatmul.mubr.msk.f32.vlgmr.msra.gmra.mrb[8].mxu1 %vm679_vm2, %v924_v5 }
 0x3db   : > { %2744 = vmatprep.mubr.msk.f32.mxu1 %vm2963_vm0, %v2964_v11  ;;  %2743 = vmatpush3.msra.mxu1 %v1088_v26  ;;  %v2549_v26 = vld [vmem:[%s3401_s2 + $0x78] sm:$0xff] }
 0x3dc   : > { %2752 = vmatprep.subr.mxu1 %v2964_v11  ;;  %v2911_v27 = vpack.c.bf16 %v2549_v26, %v2548_v25  ;;  %v2574_v26 = vld [vmem:[%s3410_s11] ss:$0 sm:$0xff] }
 0x4ad   : > { %v1163_v13 = vpop.f32.mrb[8].mxu1 }
 0x4ae   : > { %v2741_v16 = vpop.f32.mrb[9].mxu1  ;;  %v1167_v17 = vsel %vm679_vm2, %v1163_v13, -inf }
 0x4af   : > { %1168 = vmax.xlane.f32.xlu1 %v1167_v17 }
 0x53c   : > { %v1169_v18 = vpop.xlane.xlu1 %1168 }
 0x53d   : > { %v1170_v19 = vsub.f32 %v1163_v13, %v1169_v18  ;;  %v2539_v13 = vld [vmem:[%s3406_s7 + $0x2] ss:$0 sm:$0xff]  ;;  %v2544_v18 = vld [vmem:[%s3407_s8 + $0x10] sm:$0xff] }
 0x53f   : > { %v1171_v20 = vmul.f32 1.442695, %v1170_v19 }
 0x541   : > { %2940 = vpow2.f32 %v1171_v20 }
 0x54b   : > { %v2941_v21 = vpop.eup %2940 }
 0x54c   : > { %v1173_v22 = vsel %vm679_vm2, %v2941_v21, 0.0 }
 0x54d   : > { %1174 = vadd.xlane.f32.xlu1 %v1173_v22  ;;  %v2546_v22 = vld [vmem:[%s3401_s2 + $0x60] sm:$0xff] }
 0x54e   : > { %v2908_v24 = vpack.c.bf16 %v2547_v23, %v2546_v22 }
 0x5da   : > { %v1175_v28 = vpop.xlane.xlu1 %1174 }
 0x5db   : > { %2942 = vrcp.f32 %v1175_v28  ;;  %v2553_v28 = vld [vmem:[%s3403_s4 + $0x60] sm:$0xff] }
 0x5e5   : > { %v2943_v29 = vpop.eup %2942 }
 0x5e6   : > { %v1177_v30 = vmul.f32 %v2943_v29, %v2941_v21  ;;  %v2554_v29 = vld [vmem:[%s3403_s4 + $0x68] sm:$0xff] }
 0x5e8   : > { %2745 = vmatmul.mubr.msk.f32.vlgmr.msra.gmra.mrb[10].mxu1 %vm679_vm2, %v1177_v30  ;;  %v2914_v30 = vpack.c.bf16 %v2554_v29, %v2553_v28 }
 0x5e9   : > { %2753 = vmatpush3.msra.mxu1 %v840_v31  ;;  %2754 = vmatprep.mubr.msk.f32.mxu1 %vm2963_vm0, %v2964_v11  ;;  %v2555_v31 = vld [vmem:[%s3403_s4 + $0x70] sm:$0xff] }
 0x5ea   : > { %2895 = vmatprep.subr.bf16.mxu1 %v2962_v3  ;;  %v2917_v35 = vpack.c.bf16 %v2556_v32, %v2555_v31 }
 0x5ec   : > { %2755 = vmatmul.mubr.msk.f32.vlgmr.msra.gmra.mrb[12].mxu1 %vm679_vm2, %v836_v60  ;;  %v2534_v60 = vld [vmem:[%s3405_s6 + $0x40] sm:$0xff] }
 0x5ed   : > { %2897 = vmatpush3.bf16.msra.mxu1 %v2896_v34  ;;  %2776 = vmatprep.mubr.msk.f32.mxu1 %vm2963_vm0, %v2964_v11  ;;  %v2902_v63 = vpack.c.bf16 %v2535_v61, %v2534_v60 }
 0x5ee   : > { %2898 = vmatprep.subr.bf16.mxu1 %v2962_v3 }
 0x5f1   : > { %2900 = vmatpush3.bf16.msra.mxu1 %v2899_v37 }
 0x5f2   : > { %2790 = vmatprep.subr.mxu1 %v2964_v11 }
 0x5f4   : > { %2777 = vmatmul.mubr.msk.f32.vlgmr.msra.gmra.mrb[14].mxu1 %vm439_vm1, %v3082_v15 }
 0x5f5   : > { %2792 = vmatprep.mubr.msk.f32.mxu1 %vm2963_vm0, %v2964_v11 }
 0x6bb   : > { %v1247_v43 = vpop.f32.mrb[10].mxu1 }
 0x6bc   : > { %v2746_v44 = vpop.f32.mrb[11].mxu1  ;;  %2750 = vmatmul.mubr.msk.f32.vlgmr.msra.gmra.mrb[8].mxu0 %vm679_vm2, %v1247_v43 }
 0x6bd   : > { %2891 = vmatpush3.bf16.msra.mxu0 %v2890_v40  ;;  %2765 = vmatprep.mubr.msk.f32.mxu0 %vm2963_vm0, %v2964_v11 }
 0x6be   : > { %2892 = vmatprep.subr.bf16.mxu0 %v2962_v3 }
 0x6bf   : > { %v1395_v46 = vpop.f32.mrb[12].mxu1 }
 0x6c0   : > { %v2756_v47 = vpop.f32.mrb[13].mxu1 }
 0x6c1   : > { %2894 = vmatpush3.bf16.msra.mxu0 %v2893_v45 }
 0x6c2   : > { %2901 = vmatprep.subr.bf16.mxu0 %v2962_v3 }
 0x6c4   : > { %2766 = vmatmul.mubr.msk.f32.vlgmr.msra.gmra.mrb[10].mxu0 %vm439_vm1, %v3080_v14 }
 0x6c5   : > { %2787 = vmatprep.mubr.msk.f32.mxu0 %vm2963_vm0, %v2964_v11  ;;  %2903 = vmatpush3.bf16.msra.mxu0 %v2902_v63  ;;  %v2570_v63 = vld [vmem:[%s3407_s8 + $0x18] sm:$0xff] }
 0x6c6   : > { %2904 = vmatprep.subr.bf16.mxu0 %v2962_v3 }
 0x6c7   : > { %v1562_v49 = vpop.f32.mrb[14].mxu1 }
 0x6c8   : > { %v1563_v50 = vadd.f32 %v2532_v48, %v1562_v49  ;;  %v2778_v51 = vpop.f32.mrb[15].mxu1  ;;  %v2560_v48 = vld [vmem:[%s3405_s6 + $0x60] sm:$0xff]  ;;  %v2561_v49 = vld [vmem:[%s3405_s6 + $0x68] sm:$0xff] }
 0x6c9   : > { %2906 = vmatpush3.bf16.msra.mxu0 %v2905_v1  ;;  %v2920_v51 = vpack.c.bf16 %v2561_v49, %v2560_v48 }
 0x6ca   : > { %2791 = vmatpush3.xpose.msk.msra.mxu1 %vm679_vm2, %v1563_v50  ;;  %2800 = vmatprep.subr.mxu0 %v2964_v11  ;;  %v2562_v50 = vld [vmem:[%s3405_s6 + $0x70] sm:$0xff] }
 0x6cb   : > { %2795 = vmatprep.subr.mxu1 %v2964_v11 }
 0x6cc   : > { %2788 = vmatmul.mubr.msk.f32.vlgmr.msra.gmra.mrb[12].mxu0 %vm439_vm1, %v3082_v15 }
 0x6cd   : > { %2802 = vmatprep.mubr.msk.f32.mxu0 %vm2963_vm0, %v2964_v11  ;;  %2801 = vmatpush3.msra.mxu0 %v2544_v18 }
 0x6ce   : > { %2913 = vmatprep.subr.bf16.mxu0 %v2962_v3 }
 0x78f   : > { %v1322_v52 = vpop.f32.mrb[8].mxu0 }
 0x790   : > { %v3261_v53 = vadd.f32 %v1395_v46, %v1322_v52  ;;  %v2751_v54 = vpop.f32.mrb[9].mxu0  ;;  %v2563_v52 = vld [vmem:[%s3405_s6 + $0x78] sm:$0xff] }
 0x797   : > { %v1478_v56 = vpop.f32.mrb[10].mxu0 }
 0x798   : > { %v1479_v57 = vadd.f32 %v2525_v55, %v1478_v56  ;;  %v2767_v58 = vpop.f32.mrb[11].mxu0 }
 0x79a   : > { %v1482_v59 = vmul.f32 0.35355338, %v1479_v57 }
 0x79c   : > { %2793 = vmatmul.mubr.msk.f32.vlgmr.msra.gmra.mrb[16].mxu1 %vm679_vm2, %v1482_v59 }
 0x79d   : > { %2797 = vmatprep.mubr.msk.f32.mxu1 %vm2963_vm0, %v2964_v11 }
 0x79f   : > { %v1645_v12 = vpop.f32.mrb[12].mxu0 }
 0x7a0   : > { %v2789_v16 = vpop.f32.mrb[13].mxu0  ;;  %v1646_v17 = vadd.f32 %v2539_v13, %v1645_v12 }
 0x7a2   : > { %2796 = vmatpush3.msra.mxu1 %v1646_v17 }
 0x7a3   : > { %2907 = vmatprep.subr.bf16.mxu1 %v2962_v3 }
 0x86f   : > { %v1721_v2 = vpop.f32.mrb[16].mxu1 }
 0x870   : > { %v2794_v4 = vpop.f32.mrb[17].mxu1  ;;  %v1725_v5 = vsel %vm679_vm2, %v1721_v2, -inf }
 0x871   : > { %1726 = vmax.xlane.f32.xlu0 %v1725_v5 }
 0x8fe   : > { %v1727_v6 = vpop.xlane.xlu0 %1726 }
 0x8ff   : > { %v1728_v7 = vsub.f32 %v1721_v2, %v1727_v6 }
 0x901   : > { %v1729_v8 = vmul.f32 1.442695, %v1728_v7 }
 0x903   : > { %2944 = vpow2.f32 %v1729_v8 }
 0x90d   : > { %v2945_v9 = vpop.eup %2944 }
 0x90e   : > { %v1731_v10 = vsel %vm679_vm2, %v2945_v9, 0.0 }
 0x90f   : > { %1732 = vadd.xlane.f32.xlu1 %v1731_v10 }
 0x99c   : > { %v1733_v19 = vpop.xlane.xlu1 %1732 }
 0x99d   : > { %2946 = vrcp.f32 %v1733_v19 }
 0x9a7   : > { %v2947_v20 = vpop.eup %2946 }
 0x9a8   : > { %v1735_v21 = vmul.f32 %v2947_v20, %v2945_v9  ;;  %v2572_v9 = vld [vmem:[%s3408_s9] ss:$0 sm:$0xff] }
 0x9aa   : > { %2798 = vmatmul.mubr.msk.f32.vlgmr.msra.gmra.mrb[18].mxu1 %vm679_vm2, %v1735_v21 }
 0x9ab   : > { %2813 = vmatprep.mubr.msk.f32.mxu1 %vm2963_vm0, %v2964_v11  ;;  %2909 = vmatpush3.bf16.msra.mxu1 %v2908_v24 }
 0x9ac   : > { %2910 = vmatprep.subr.bf16.mxu1 %v2962_v3 }
 0x9af   : > { %2912 = vmatpush3.bf16.msra.mxu1 %v2911_v27 }
 0x9b0   : > { %2919 = vmatprep.subr.bf16.mxu1 %v2962_v3 }
 0x9b2   : > { %2814 = vmatmul.mubr.msk.f32.vlgmr.msra.gmra.mrb[20].mxu1 %vm439_vm1, %v3080_v14 }
 0x9b3   : > { %2835 = vmatprep.mubr.msk.f32.mxu1 %vm2963_vm0, %v2964_v11  ;;  %2921 = vmatpush3.bf16.msra.mxu1 %v2920_v51 }
 0x9b4   : > { %2922 = vmatprep.subr.bf16.mxu1 %v2962_v3 }
 0xa7d   : > { %v1805_v33 = vpop.f32.mrb[18].mxu1 }
 0xa7e   : > { %v2799_v34 = vpop.f32.mrb[19].mxu1  ;;  %2803 = vmatmul.mubr.msk.f32.vlgmr.msra.gmra.mrb[14].mxu0 %vm679_vm2, %v1805_v33 }
 0xa7f   : > { %2915 = vmatpush3.bf16.msra.mxu0 %v2914_v30  ;;  %2824 = vmatprep.mubr.msk.f32.mxu0 %vm2963_vm0, %v2964_v11 }
 0xa80   : > { %2916 = vmatprep.subr.bf16.mxu0 %v2962_v3 }
 0xa83   : > { %2918 = vmatpush3.bf16.msra.mxu0 %v2917_v35 }
 0xa84   : > { %2838 = vmatprep.subr.mxu0 %v2964_v11 }
 0xa85   : > { %v1964_v36 = vpop.f32.mrb[20].mxu1 }
 0xa86   : > { %2825 = vmatmul.mubr.msk.f32.vlgmr.msra.gmra.mrb[16].mxu0 %vm439_vm1, %v3082_v15  ;;  %v2815_v37 = vpop.f32.mrb[21].mxu1  ;;  %v1965_v43 = vadd.f32 %v2551_v41, %v1964_v36 }
 0xa87   : > { %2840 = vmatprep.mubr.msk.f32.mxu0 %vm2963_vm0, %v2964_v11 }
 0xa88   : > { %v1968_v47 = vmul.f32 0.35355338, %v1965_v43 }
 0xb51   : > { %v1880_v38 = vpop.f32.mrb[14].mxu0 }
 0xb52   : > { %v1884_v39 = vadd.f32 %v1880_v38, %v3261_v53  ;;  %v2804_v40 = vpop.f32.mrb[15].mxu0  ;;  %v2923_v53 = vpack.c.bf16 %v2563_v52, %v2562_v50 }
 0xb54   : > { %2924 = vmatpush3.bf16.msra.mxu1 %v2923_v53 }
 0xb55   : > { %2848 = vmatprep.subr.mxu1 %v2964_v11 }
 0xb57   : > { %2836 = vmatmul.mubr.msk.f32.vlgmr.msra.gmra.mrb[22].mxu1 %vm439_vm1, %v3082_v15  ;;  %v2565_v15 = vld [vmem:[%s3406_s7 + $0x3] ss:$0 sm:$0xff] }
 0xb58   : > { %2850 = vmatprep.mubr.msk.f32.mxu1 %vm2963_vm0, %v2964_v11  ;;  %2849 = vmatpush3.msra.mxu1 %v2570_v63 }
 0xb59   : > { %v2048_v44 = vpop.f32.mrb[16].mxu0 }
 0xb5a   : > { %v2049_v45 = vadd.f32 %v2558_v42, %v2048_v44  ;;  %v2826_v46 = vpop.f32.mrb[17].mxu0 }
 0xb5c   : > { %2839 = vmatpush3.xpose.msk.msra.mxu0 %vm679_vm2, %v2049_v45 }
 0xb5d   : > { %2843 = vmatprep.subr.mxu0 %v2964_v11 }
 0xb5f   : > { %2841 = vmatmul.mubr.msk.f32.vlgmr.msra.gmra.mrb[18].mxu0 %vm679_vm2, %v1968_v47 }
 0xb60   : > { %2845 = vmatprep.mubr.msk.f32.mxu0 %vm2963_vm0, %v2964_v11 }
 0xc2a   : > { %v2131_v61 = vpop.f32.mrb[22].mxu1 }
 0xc2b   : > { %v2837_v62 = vpop.f32.mrb[23].mxu1  ;;  %v2132_v11 = vadd.f32 %v2565_v15, %v2131_v61 }
 0xc2d   : > { %2844 = vmatpush3.msra.mxu0 %v2132_v11 }
 0xc32   : > { %v2207_v54 = vpop.f32.mrb[18].mxu0 }
 0xc33   : > { %v2842_v55 = vpop.f32.mrb[19].mxu0  ;;  %v2211_v56 = vsel %vm679_vm2, %v2207_v54, -inf }
 0xc34   : > { %2212 = vmax.xlane.f32.xlu0 %v2211_v56 }
 0xcc1   : > { %v2213_v57 = vpop.xlane.xlu0 %2212 }
 0xcc2   : > { %v2214_v58 = vsub.f32 %v2207_v54, %v2213_v57 }
 0xcc4   : > { %v2215_v59 = vmul.f32 1.442695, %v2214_v58 }
 0xcc6   : > { %2948 = vpow2.f32 %v2215_v59 }
 0xcd0   : > { %v2949_v60 = vpop.eup %2948 }
 0xcd1   : > { %v2217_v3 = vsel %vm679_vm2, %v2949_v60, 0.0 }
 0xcd2   : > { %2218 = vadd.xlane.f32.xlu1 %v2217_v3 }
 0xd5f   : > { %v2219_v0 = vpop.xlane.xlu1 %2218 }
 0xd60   : > { %2950 = vrcp.f32 %v2219_v0 }
 0xd6a   : > { %v2951_v1 = vpop.eup %2950 }
 0xd6b   : > { %v2221_v2 = vmul.f32 %v2951_v1, %v2949_v60 }
 0xd6d   : > { %2846 = vmatmul.mubr.msk.f32.vlgmr.msra.gmra.mrb[20].mxu0 %vm679_vm2, %v2221_v2 }
 0xe40   : > { %v2291_v4 = vpop.f32.mrb[20].mxu0 }
 0xe41   : > { %v2847_v5 = vpop.f32.mrb[21].mxu0  ;;  %2851 = vmatmul.mubr.msk.f32.vlgmr.msra.gmra.mrb[24].mxu1 %vm679_vm2, %v2291_v4 }
 0xf14   : > { %v2366_v6 = vpop.f32.mrb[24].mxu1 }
 0xf15   : > { %v2370_v7 = vadd.f32 %v2366_v6, %v1884_v39  ;;  %v2852_v8 = vpop.f32.mrb[25].mxu1 }
 0xf17   : > { %v2371_v10 = vadd.f32 %v2370_v7, %v3080_v14  ;;  %v2573_v14 = vld [vmem:[%s3409_s10] ss:$0 sm:$0xff] }
 0xf19   : > { %v2379_v12 = vadd.f32 %v2572_v9, %v2371_v10 }
 0xf1b   : > { %v2380_v13 = vsel %vm439_vm1, %v2379_v12, 0.0 }
 0xf1c   : > { %2381 = vadd.xlane.f32.xlu0 %v2380_v13 }
 0xfa9   : > { %v2382_v16 = vpop.xlane.xlu0 %2381 }
 0xfaa   : > { %v2384_v17 = vmul.f32 0.03125, %v2382_v16 }
 0xfac   : > { %v2385_v18 = vsub.f32 %v2379_v12, %v2384_v17 }
 0xfae   : > { %v2386_v19 = vmul.f32 %v2385_v18, %v2385_v18 }
 0xfb0   : > { %v2387_v20 = vsel %vm439_vm1, %v2386_v19, 0.0 }
 0xfb1   : > { %2388 = vadd.xlane.f32.xlu1 %v2387_v20 }
0x103e   : > { %v2389_v21 = vpop.xlane.xlu1 %2388 }
0x103f   : > { %v2390_v22 = vmul.f32 0.03125, %v2389_v21 }
0x1041   : > { %v2391_v23 = vadd.f32 1e-05, %v2390_v22 }
0x1043   : > { %2952 = vrsqrt.f32 %v2391_v23 }
0x104d   : > { %v2953_v24 = vpop.eup %2952 }
0x104e   : > { %v2393_v25 = vmul.f32 %v2953_v24, %v2385_v18 }
0x1050   : > { %v2401_v27 = vmul.f32 %v2573_v14, %v2393_v25 }
0x1052   : > { %v2409_v28 = vadd.f32 %v2574_v26, %v2401_v27 }
0x1054   : > { %2410 = vst.msk [vmem:[%s425_s19] sm:$0xff] %vm439_vm1, %v2409_v28 }
0x1055 PF: > { %s22_s21 = sadd.s32 1, %s2960_s21  }
0x1056   : > { %p19_p4 = scmp.ge.s32.totalorder %s22_s21, 4  }
0x1058   :  { %21 = sbr.rel (!%p19_p4) target bundleno = 1 (0x1), region = 122 }

</bundles_post_ra>
